<compile_context>
chip_gen: v7x
topology: tpu7x:2x2x1
jax: 0.10.0
libtpu: 0.0.40
codegen_flags: <defaults>
</compile_context>

<pallas_src>
import functools

import jax
import jax.numpy as jnp
import numpy as np
from jax.experimental import pallas as pl
from jax.experimental.pallas import tpu as pltpu


def _gfu_kernel(x_ref, h_ref, wx_ref, wh_ref, bf_ref, bhn_ref, o_ref, *, h_channels):
    C = h_channels
    x = x_ref[...].astype(jnp.float32)           # (Cx, tn)
    h = h_ref[...].astype(jnp.float32)           # (Ch, tn)

    # Fused 1x1-conv projections for all three gates at once (MXU).
    gx = jnp.dot(wx_ref[...], x, preferred_element_type=jnp.float32)   # (3Ch, tn)
    gh = jnp.dot(wh_ref[...], h, preferred_element_type=jnp.float32)   # (3Ch, tn)

    bf = bf_ref[...]                              # (3Ch, 1): [bxr+bhr | bxz+bhz | bxn]
    bhn = bhn_ref[...]                            # (Ch, 1)

    # Sublane slices (offsets are multiples of 8) + lane-broadcast biases.
    r = jax.nn.sigmoid(gx[0:C] + gh[0:C] + bf[0:C])
    z = jax.nn.sigmoid(gx[C:2 * C] + gh[C:2 * C] + bf[C:2 * C])
    pre = gx[2 * C:3 * C] + bf[2 * C:3 * C] + r * (gh[2 * C:3 * C] + bhn)
    n = jnp.where(pre >= 0.0, pre, 0.2 * pre)     # LeakyReLU(0.2)

    o_ref[...] = ((1.0 - z) * n + z * h).astype(o_ref.dtype)


def gfu_fuse_params(params):
    """Fuse per-gate conv weights / biases. Call once, outside the hot path."""
    wx = jnp.concatenate(
        [params["wxr_w"], params["wxz_w"], params["wxn_w"]], axis=0)   # (3Ch, Cx)
    wh = jnp.concatenate(
        [params["whr_w"], params["whz_w"], params["whn_w"]], axis=0)   # (3Ch, Ch)
    b_fold = jnp.concatenate([
        params["wxr_b"] + params["whr_b"],
        params["wxz_b"] + params["whz_b"],
        params["wxn_b"],
    ])[:, None]                                                        # (3Ch, 1)
    bhn = params["whn_b"][:, None]                                     # (Ch, 1)
    return {"wx": wx, "wh": wh, "b_fold": b_fold, "bhn": bhn}


def _pick_tile(N, Cx, Ch, tile_n, vmem_budget_bytes=24 * 1024 * 1024):
    """Largest multiple-of-128 lane tile that fits the VMEM budget (f32)."""
    if N < 128:
        return N, 1                                # block == full dim (legal)
    # Conservative per-output-column VMEM footprint:
    #   double-buffered in/out tiles + gx/gh matmul results + gating temps.
    per_col = 4 * (2 * (Cx + 2 * Ch) + 2 * 3 * Ch + 8 * Ch)
    max_cols = max(128, (vmem_budget_bytes // per_col) // 128 * 128)
    tile = min(tile_n, max_cols, (N // 128) * 128)
    tile = max(128, (tile // 128) * 128)
    return tile, pl.cdiv(N, tile)


def gfu_forward(x, h, fused, *, tile_n=1024):
    """x: (B, Cx, N), h: (B, Ch, N) -> (B, Ch, N). Matches PyTorch GFU.forward."""
    B, Cx, N = x.shape
    _, Ch, _ = h.shape
    wx, wh, b_fold, bhn = fused["wx"], fused["wh"], fused["b_fold"], fused["bhn"]

    tile, n_tiles = _pick_tile(N, Cx, Ch, tile_n)
    grid = (B, n_tiles)   # both parallel -> shards across v7x's 2 TCs

    # Advisory cost hint: bandwidth-dominated custom call with tiny FLOP count.
    flops = 2 * B * N * 3 * Ch * (Cx + Ch) + 10 * B * N * Ch
    bytes_accessed = 4 * (B * N * (Cx + 2 * Ch) + 3 * Ch * (Cx + Ch + 1) + Ch)
    cost = pl.CostEstimate(flops=flops,
                           transcendentals=2 * B * N * Ch,
                           bytes_accessed=bytes_accessed)

    kernel = functools.partial(_gfu_kernel, h_channels=Ch)
    out = pl.pallas_call(
        kernel,
        out_shape=jax.ShapeDtypeStruct((B, Ch, N), h.dtype),
        grid_spec=pltpu.PrefetchScalarGridSpec(
            num_scalar_prefetch=0,
            grid=grid,
            in_specs=[
                pl.BlockSpec((None, Cx, tile), lambda b, j: (b, 0, j)),
                pl.BlockSpec((None, Ch, tile), lambda b, j: (b, 0, j)),
                pl.BlockSpec((3 * Ch, Cx), lambda b, j: (0, 0)),   # resident weights
                pl.BlockSpec((3 * Ch, Ch), lambda b, j: (0, 0)),
                pl.BlockSpec((3 * Ch, 1), lambda b, j: (0, 0)),
                pl.BlockSpec((Ch, 1), lambda b, j: (0, 0)),
            ],
            out_specs=pl.BlockSpec((None, Ch, tile), lambda b, j: (b, 0, j)),
        ),
        compiler_params=pltpu.CompilerParams(
            dimension_semantics=("parallel", "parallel"),
            vmem_limit_bytes=32 * 1024 * 1024,   # safe on v5e/v6e (128 MiB) and v7x (64 MiB)
        ),
        cost_estimate=cost,
    )(x, h, wx, wh, b_fold, bhn)
    return out


def init_params(key, x_channels, h_channels):
    ks = jax.random.split(key, 12)
    def w(k, o, i):  # conv1d weight (out, in) — kernel_size=1 squeezed
        return jax.random.normal(k, (o, i), jnp.float32) * 0.1
    def b(k, o):
        return jax.random.normal(k, (o,), jnp.float32) * 0.1
    return {
        "wxr_w": w(ks[0], h_channels, x_channels), "wxr_b": b(ks[1], h_channels),
        "wxz_w": w(ks[2], h_channels, x_channels), "wxz_b": b(ks[3], h_channels),
        "wxn_w": w(ks[4], h_channels, x_channels), "wxn_b": b(ks[5], h_channels),
        "whr_w": w(ks[6], h_channels, h_channels), "whr_b": b(ks[7], h_channels),
        "whz_w": w(ks[8], h_channels, h_channels), "whz_b": b(ks[9], h_channels),
        "whn_w": w(ks[10], h_channels, h_channels), "whn_b": b(ks[11], h_channels),
    }


def gfu_reference(x, h, p):
    """Pure-JAX reference mirroring the PyTorch module."""
    def conv(w, bias, inp):  # inp (B, Cin, N) -> (B, Cout, N)
        return jnp.einsum("oc,bcn->bon", w, inp) + bias[None, :, None]
    r = jax.nn.sigmoid(conv(p["wxr_w"], p["wxr_b"], x) + conv(p["whr_w"], p["whr_b"], h))
    z = jax.nn.sigmoid(conv(p["wxz_w"], p["wxz_b"], x) + conv(p["whz_w"], p["whz_b"], h))
    pre = conv(p["wxn_w"], p["wxn_b"], x) + r * conv(p["whn_w"], p["whn_b"], h)
    n = jnp.where(pre >= 0.0, pre, 0.2 * pre)
    return (1.0 - z) * n + z * h


if __name__ == "__main__":
    # N deliberately not a multiple of 128 to exercise the ragged boundary block.
    B, Cx, Ch, N = 2, 16, 32, 1000
    key = jax.random.PRNGKey(0)
    kx, kh, kp = jax.random.split(key, 3)
    x = jax.random.normal(kx, (B, Cx, N), jnp.float32)
    h = jax.random.normal(kh, (B, Ch, N), jnp.float32)
    params = init_params(kp, Cx, Ch)
    fused = gfu_fuse_params(params)   # hoisted out of the hot path

    out = gfu_forward(x, h, fused)
    out = jax.block_until_ready(out)

    ref = jax.block_until_ready(gfu_reference(x, h, params))
    np.testing.assert_allclose(np.asarray(out), np.asarray(ref), rtol=1e-5, atol=1e-5)

    print("KERNEL_OK")
</pallas_src>

<mosaic_0001>
module attributes {stable_mosaic.version = 11 : i64} {
  func.func @_gfu_kernel(%arg0: i32, %arg1: i32, %arg2: memref<1x16x896xf32, #tpu.memory_space<vmem>>, %arg3: memref<1x32x896xf32, #tpu.memory_space<vmem>>, %arg4: memref<96x16xf32, #tpu.memory_space<vmem>>, %arg5: memref<96x32xf32, #tpu.memory_space<vmem>>, %arg6: memref<96x1xf32, #tpu.memory_space<vmem>>, %arg7: memref<32x1xf32, #tpu.memory_space<vmem>>, %arg8: memref<1x32x896xf32, #tpu.memory_space<vmem>>) attributes {dimension_semantics = [#tpu.dimension_semantics<parallel>, #tpu.dimension_semantics<parallel>], iteration_bounds = array<i64: 2, 2>, scalar_prefetch = 0 : i64, scratch_operands = 0 : i64, tpu.core_type = #tpu.core_type<tc>, window_params = [{transform_indices = @transform_0, window_bounds = array<i64: 1, 16, 896>}, {transform_indices = @transform_1, window_bounds = array<i64: 1, 32, 896>}, {pipeline_mode = #tpu.pipeline_mode<synchronous>, transform_indices = @transform_2, window_bounds = array<i64: 96, 16>}, {pipeline_mode = #tpu.pipeline_mode<synchronous>, transform_indices = @transform_3, window_bounds = array<i64: 96, 32>}, {pipeline_mode = #tpu.pipeline_mode<synchronous>, transform_indices = @transform_4, window_bounds = array<i64: 96, 1>}, {pipeline_mode = #tpu.pipeline_mode<synchronous>, transform_indices = @transform_5, window_bounds = array<i64: 32, 1>}, {transform_indices = @transform_6, window_bounds = array<i64: 1, 32, 896>}]} {
    %c0 = arith.constant 0 : index
    %c0_0 = arith.constant 0 : index
    %c0_1 = arith.constant 0 : index
    %0 = vector.load %arg2[%c0, %c0_0, %c0_1] : memref<1x16x896xf32, #tpu.memory_space<vmem>>, vector<1x16x896xf32>
    %1 = vector.shape_cast %0 : vector<1x16x896xf32> to vector<16x896xf32>
    %c0_2 = arith.constant 0 : index
    %c0_3 = arith.constant 0 : index
    %c0_4 = arith.constant 0 : index
    %2 = vector.load %arg3[%c0_2, %c0_3, %c0_4] : memref<1x32x896xf32, #tpu.memory_space<vmem>>, vector<1x32x896xf32>
    %3 = vector.shape_cast %2 : vector<1x32x896xf32> to vector<32x896xf32>
    %c0_5 = arith.constant 0 : index
    %c0_6 = arith.constant 0 : index
    %4 = vector.load %arg4[%c0_5, %c0_6] : memref<96x16xf32, #tpu.memory_space<vmem>>, vector<96x16xf32>
    %cst = arith.constant dense<0.000000e+00> : vector<96x896xf32>
    %5 = tpu.matmul %4, %1, %cst {dimension_numbers = #tpu.dot_dimension_numbers<[1], [0], [0], [1], [0, 0, 1, 1], [], []>} : vector<96x16xf32>, vector<16x896xf32>, vector<96x896xf32> -> vector<96x896xf32>
    %c0_7 = arith.constant 0 : index
    %c0_8 = arith.constant 0 : index
    %6 = vector.load %arg5[%c0_7, %c0_8] : memref<96x32xf32, #tpu.memory_space<vmem>>, vector<96x32xf32>
    %cst_9 = arith.constant dense<0.000000e+00> : vector<96x896xf32>
    %7 = tpu.matmul %6, %3, %cst_9 {dimension_numbers = #tpu.dot_dimension_numbers<[1], [0], [0], [1], [0, 0, 1, 1], [], []>} : vector<96x32xf32>, vector<32x896xf32>, vector<96x896xf32> -> vector<96x896xf32>
    %c0_10 = arith.constant 0 : index
    %c0_11 = arith.constant 0 : index
    %8 = vector.load %arg6[%c0_10, %c0_11] : memref<96x1xf32, #tpu.memory_space<vmem>>, vector<96x1xf32>
    %c0_12 = arith.constant 0 : index
    %c0_13 = arith.constant 0 : index
    %9 = vector.load %arg7[%c0_12, %c0_13] : memref<32x1xf32, #tpu.memory_space<vmem>>, vector<32x1xf32>
    %10 = vector.extract_strided_slice %5 {offsets = [0, 0], sizes = [32, 896], strides = [1, 1]} : vector<96x896xf32> to vector<32x896xf32>
    %11 = vector.extract_strided_slice %7 {offsets = [0, 0], sizes = [32, 896], strides = [1, 1]} : vector<96x896xf32> to vector<32x896xf32>
    %12 = arith.addf %10, %11 : vector<32x896xf32>
    %13 = vector.extract_strided_slice %8 {offsets = [0, 0], sizes = [32, 1], strides = [1, 1]} : vector<96x1xf32> to vector<32x1xf32>
    %14 = vector.broadcast %13 : vector<32x1xf32> to vector<32x896xf32>
    %15 = arith.addf %12, %14 : vector<32x896xf32>
    %16 = arith.negf %15 : vector<32x896xf32>
    %17 = math.exp %16 : vector<32x896xf32>
    %cst_14 = arith.constant 1.000000e+00 : f32
    %18 = vector.broadcast %cst_14 : f32 to vector<32x896xf32>
    %19 = arith.addf %18, %17 : vector<32x896xf32>
    %20 = arith.divf %18, %19 : vector<32x896xf32>
    %21 = vector.extract_strided_slice %5 {offsets = [32, 0], sizes = [32, 896], strides = [1, 1]} : vector<96x896xf32> to vector<32x896xf32>
    %22 = vector.extract_strided_slice %7 {offsets = [32, 0], sizes = [32, 896], strides = [1, 1]} : vector<96x896xf32> to vector<32x896xf32>
    %23 = arith.addf %21, %22 : vector<32x896xf32>
    %24 = vector.extract_strided_slice %8 {offsets = [32, 0], sizes = [32, 1], strides = [1, 1]} : vector<96x1xf32> to vector<32x1xf32>
    %25 = vector.broadcast %24 : vector<32x1xf32> to vector<32x896xf32>
    %26 = arith.addf %23, %25 : vector<32x896xf32>
    %27 = arith.negf %26 : vector<32x896xf32>
    %28 = math.exp %27 : vector<32x896xf32>
    %cst_15 = arith.constant 1.000000e+00 : f32
    %29 = vector.broadcast %cst_15 : f32 to vector<32x896xf32>
    %30 = arith.addf %29, %28 : vector<32x896xf32>
    %31 = arith.divf %29, %30 : vector<32x896xf32>
    %32 = vector.extract_strided_slice %5 {offsets = [64, 0], sizes = [32, 896], strides = [1, 1]} : vector<96x896xf32> to vector<32x896xf32>
    %33 = vector.extract_strided_slice %8 {offsets = [64, 0], sizes = [32, 1], strides = [1, 1]} : vector<96x1xf32> to vector<32x1xf32>
    %34 = vector.broadcast %33 : vector<32x1xf32> to vector<32x896xf32>
    %35 = arith.addf %32, %34 : vector<32x896xf32>
    %36 = vector.extract_strided_slice %7 {offsets = [64, 0], sizes = [32, 896], strides = [1, 1]} : vector<96x896xf32> to vector<32x896xf32>
    %37 = vector.broadcast %9 : vector<32x1xf32> to vector<32x896xf32>
    %38 = arith.addf %36, %37 : vector<32x896xf32>
    %39 = arith.mulf %20, %38 : vector<32x896xf32>
    %40 = arith.addf %35, %39 : vector<32x896xf32>
    %cst_16 = arith.constant 0.000000e+00 : f32
    %41 = vector.broadcast %cst_16 : f32 to vector<32x896xf32>
    %42 = arith.cmpf oge, %40, %41 : vector<32x896xf32>
    %cst_17 = arith.constant 2.000000e-01 : f32
    %43 = vector.broadcast %cst_17 : f32 to vector<32x896xf32>
    %44 = arith.mulf %43, %40 : vector<32x896xf32>
    %45 = arith.select %42, %40, %44 : vector<32x896xi1>, vector<32x896xf32>
    %cst_18 = arith.constant 1.000000e+00 : f32
    %46 = vector.broadcast %cst_18 : f32 to vector<32x896xf32>
    %47 = arith.subf %46, %31 : vector<32x896xf32>
    %48 = arith.mulf %47, %45 : vector<32x896xf32>
    %49 = arith.mulf %31, %3 : vector<32x896xf32>
    %50 = arith.addf %48, %49 : vector<32x896xf32>
    %c0_19 = arith.constant 0 : index
    %c0_20 = arith.constant 0 : index
    %c0_21 = arith.constant 0 : index
    %51 = vector.load %arg8[%c0_19, %c0_20, %c0_21] : memref<1x32x896xf32, #tpu.memory_space<vmem>>, vector<1x32x896xf32>
    %52 = vector.shape_cast %51 : vector<1x32x896xf32> to vector<32x896xf32>
    %53 = vector.shape_cast %50 : vector<32x896xf32> to vector<1x32x896xf32>
    tpu.vector_store %arg8[%c0_19, %c0_20, %c0_21], %53 {strides = array<i32>} : memref<1x32x896xf32, #tpu.memory_space<vmem>>, vector<1x32x896xf32>,
    return
  }
  func.func @transform_0(%arg0: i32, %arg1: i32) -> (i32, i32, i32) {
    %c0_i32 = arith.constant 0 : i32
    %c0_i32_0 = arith.constant 0 : i32
    return %arg0, %c0_i32, %arg1 : i32, i32, i32
  }
  func.func @transform_1(%arg0: i32, %arg1: i32) -> (i32, i32, i32) {
    %c0_i32 = arith.constant 0 : i32
    %c0_i32_0 = arith.constant 0 : i32
    return %arg0, %c0_i32, %arg1 : i32, i32, i32
  }
  func.func @transform_2(%arg0: i32, %arg1: i32) -> (i32, i32) {
    %c0_i32 = arith.constant 0 : i32
    %c0_i32_0 = arith.constant 0 : i32
    %c0_i32_1 = arith.constant 0 : i32
    return %c0_i32, %c0_i32_0 : i32, i32
  }
  func.func @transform_3(%arg0: i32, %arg1: i32) -> (i32, i32) {
    %c0_i32 = arith.constant 0 : i32
    %c0_i32_0 = arith.constant 0 : i32
    %c0_i32_1 = arith.constant 0 : i32
    return %c0_i32, %c0_i32_0 : i32, i32
  }
  func.func @transform_4(%arg0: i32, %arg1: i32) -> (i32, i32) {
    %c0_i32 = arith.constant 0 : i32
    %c0_i32_0 = arith.constant 0 : i32
    %c0_i32_1 = arith.constant 0 : i32
    return %c0_i32, %c0_i32_0 : i32, i32
  }
  func.func @transform_5(%arg0: i32, %arg1: i32) -> (i32, i32) {
    %c0_i32 = arith.constant 0 : i32
    %c0_i32_0 = arith.constant 0 : i32
    %c0_i32_1 = arith.constant 0 : i32
    return %c0_i32, %c0_i32_0 : i32, i32
  }
  func.func @transform_6(%arg0: i32, %arg1: i32) -> (i32, i32, i32) {
    %c0_i32 = arith.constant 0 : i32
    %c0_i32_0 = arith.constant 0 : i32
    return %arg0, %c0_i32, %arg1 : i32, i32, i32
  }
}

</mosaic_0001>

<bundles_post_ra>
// kernel: tpu_custom_call.1
= control target key start
LH: loop header
LB: loop body
LE: loop exit
PB: predicated region body
PF: predicated region fallthrough
CT: control target
= control target key end

     0   :  { %s5542_s0 = inlined_call_operand.vmem [shape: f32[2,16,1000], index: 0, kind: input, shape index: {}]   ;;  %s5543_s1 = inlined_call_operand.hbm [shape: f32[2,32,1000], index: 1, kind: input, shape index: {}]   ;;  %s5544_s2 = inlined_call_operand.vmem [shape: f32[96,16], index: 2, kind: input, shape index: {}]   ;;  %s5545_s3 = inlined_call_operand.vmem [shape: f32[96,32], index: 3, kind: input, shape index: {}]   ;;  %s5546_s4 = inlined_call_operand.vmem [shape: f32[96,1], index: 4, kind: input, shape index: {}]   ;;  %s5547_s5 = inlined_call_operand.vmem [shape: f32[32,1], index: 5, kind: input, shape index: {}]   ;;  %s5548_s6 = inlined_call_operand.hbm [shape: f32[2,32,1000], index: 6, kind: output, shape index: {}]  }
   0x1   :  { %5559 = sst [smem:[#allocation37_spill]] %s5542_s0 }
   0x2   :  { %5560 = sst [smem:[#allocation38_spill]] %s5548_s6 }
   0x3   :  { %11 = vsyncpa [#allocation4], 0 }
   0x4   :  { %13 = vsyncpa [#allocation4 + $0x1], 0 }
   0x5   :  { %14 = vsyncpa [#allocation5], 0 }
   0x6   :  { %16 = vsyncpa [#allocation5 + $0x1], 0  ;;  %s4182_s21 = smov 0   ;;  %s4184_s22 = smov 0  }
   0x7   :  { %s4186_s23 = smov 0   ;;  %s4188_s24 = smov 0  }
   0x8   :  { %s4190_s25 = smov 0   ;;  %s4192_s26 = smov 0  }
   0x9   :  { %s4194_s27 = smov 0   ;;  %s4196_s28 = smov 0  }
   0xa LB: > { %5561 = sst [smem:[#allocation9_spill]] %s4075_s21  ;;  %s3059_s29 = sadd.s32 4294967295, %s4103_s28   ;;  %s4103_s28 = sphi %s4196_s28, %s22_s28   ;;  %s4099_s27 = sphi %s4194_s27, %s5630_s27   ;;  %s4095_s26 = sphi %s4192_s26, %s5629_s26   ;;  %s4091_s25 = sphi %s4190_s25, %s5628_s25   ;;  %s4087_s24 = sphi %s4188_s24, %s5627_s24   ;;  %s4083_s23 = sphi %s4186_s23, %s5626_s23   ;;  %s4079_s22 = sphi %s4184_s22, %s5625_s22   ;;  %s4075_s21 = sphi %s4182_s21, %s5624_s21  }
   0xb   : > { %5562 = sst [smem:[#allocation10_spill]] %s4087_s24  ;;  %s3060_s30 = sadd.s32 4294967294, %s4103_s28  }
   0xc   : > { %5563 = sst [smem:[#allocation11_spill]] %s4091_s25  ;;  %s31_s7 = sadd.s32 1, %s4095_s26 }
   0xd   : > { %p32_p0 = scmp.ge.s32.totalorder %s31_s7, 2  ;;  %s34_s8 = sadd.s32 1, %s4099_s27 }
   0xe   : > { %p50_p1 = scmp.ne.s32.totalorder %s4083_s23, %s4079_s22  ;;  %p51_p2 = scmp.eq.s32.totalorder %s4103_s28, 0 }
   0xf   : > { %s5632_s7 = smov (%p32_p0, %s31_s7), 0  ;;  %s5634_s8 = smov (!%p32_p0, %s34_s8), %s4099_s27 }
  0x10   : > { %5564 = sst [smem:[#allocation12_spill]] %s5632_s7  ;;  %s39_s9 = ssub.s32 %s4095_s26, %s5632_s7 }
  0x11   : > { %p4234_p3 = por %p51_p2, %p50_p1  ;;  %p36_p4 = scmp.ge.s32.totalorder %s5634_s8, 2 }
  0x12   : > { %p84_p5 = scmp.ne.s32.totalorder %s4079_s22, %s4075_s21  ;;  %p85_p6 = scmp.eq.s32.totalorder %s3059_s29, 0 }
  0x13   : > { %p194_p7 = scmp.eq.s32.totalorder %s3059_s29, 3  ;;  %s5636_s8 = smov (%p36_p4, %s5634_s8), 0 }
  0x14   : > { %5566 = sst [smem:[#allocation13_spill]] %s5636_s8  ;;  %p4242_p8 = por %p85_p6, %p84_p5 }
  0x15   : > { %p4246_p9 = por %p194_p7, %p50_p1  ;;  %s38_s13 = ssub.s32 %s4099_s27, %s5636_s8 }
  0x16   : > { %p200_p10 = scmp.eq.s32.totalorder %s3060_s30, 3  ;;  %s40_s14 = sor.u32 %s39_s9, %s38_s13 }
  0x17   : > { %s43_s15 = sadd.s32 1, %s4083_s23  ;;  %p41_p11 = scmp.eq.s32.totalorder %s40_s14, 0 }
  0x18   : > { %p4253_p12 = por %p200_p10, %p84_p5  ;;  %p3062_p13 = scmp.ge.s32.totalorder %s4103_s28, 4 }
  0x19   : > { %s4258_s17 = scalar_select %p41_p11, %s4083_s23, %s43_s15  }
  0x1a   : > { %s5569_s16 = scalar_select %p4253_p12, 1, 0 }
  0x1b   : > { %5571 = sst [smem:[#allocation15_spill]] %s4258_s17  ;;  %228 = sbr.rel (%p3062_p13) target bundleno = 157 (0x9d), region = 32 }
  0x1c   : > { %5570 = sst [smem:[#allocation14_spill]] %s5569_s16 }
  0x22   : > { %231 = sbr.rel (!%p4234_p3) target bundleno = 121 (0x79), region = 36  ;;  %s233_s18 = sand.u32 (%p4234_p3), 1, %s4083_s23  }
  0x23   : > { %s236_s19 = smul.u32 (%p4234_p3), 7, %s4095_s26  ;;  %s3065_s29 = sshll.u32 (%p4234_p3), %s4099_s27, 4 }
  0x24   : > { %s3450_s20 = smul.u32 (%p4234_p3), 112, %s233_s18  ;;  %s5572_s0 = sld [smem:[#allocation37_spill]] (%p4234_p3) }
  0x25   : > { %s237_s30 = ssub.s32 (%p4234_p3), 8, %s236_s19  ;;  %s243_s9 = sadd.s32 (%p4234_p3), %s3065_s29, %s236_s19 }
  0x26   : > { %p238_p0 = scmp.lt.s32.totalorder (%p4234_p3), %s237_s30, 7  ;;  %s3066_s13 = sshll.u32 (%p4234_p3), %s243_s9, 3 }
  0x27   : > { %s4273_s16 = scalar_lea.vmem (%p4234_p3), [#allocation2], %s3450_s20  }
  0x29   : > { %s5638_s30 = smov (!%p238_p0, %s237_s30), 7 }
  0x2a   : > { %s4269_s8 = scalar_lea.vmem %s5572_s0, %s3066_s13   ;;  %s3063_s7 = sshll.u32 %s5638_s30, 8 }
  0x2b   : > { %s4271_s17 = sshll.u32 %s5638_s30, 3  ;;  %p3068_p1 = scmp.eq.s32.totalorder %s3063_s7, 0 }
  0x2c   : > { %p250_p2 = scmp.lt.u32.totalorder (!%p3068_p1), %s4271_s17, 8 }
  0x2d   : > { %249 = sbr.rel (%p3068_p1) target bundleno = 121 (0x79), region = 40 }
  0x34   : > { %253 = sbr.rel (%p250_p2) target bundleno = 112 (0x70), region = 44  ;;  %s4277_s18 = sand.u32 (!%p250_p2), 7, %s4271_s17  }
  0x35   : > { %p271_p4 = scmp.eq.s32.totalorder (!%p250_p2), %s4277_s18, 0  ;;  %p3069_p5 = scmp.ne.s32.totalorder (!%p250_p2), %s4277_s18, 0 }
  0x3b   : > { %274 = sbr.rel (%p3069_p5) target bundleno = 83 (0x53), region = 59  ;;  %s275_s19 = sshrl.u32 (!%p3069_p5), %s4271_s17, 3 }
  0x3c   : > { %s276_s29 = sshrl.u32 (!%p3069_p5), %s275_s19, 5  ;;  %s4282_s20 = sand.u32 (!%p3069_p5), 31, %s275_s19  }
  0x3d   : > { %s3258_s7 = sshll.u32 (!%p3069_p5), %s276_s29, 12  ;;  %p3076_p6 = scmp.le.s32.totalorder (!%p3069_p5), %s4282_s20, 0 }
  0x3e   : > { %s427_s30 = sshra.s32 (!%p3069_p5), %s3258_s7, 4 }
  0x3f   : > { %s4285_s9 = scalar_lea.vmem (!%p3069_p5), %s4269_s8, %s427_s30   ;;  %s431_s13 = scalar_lea.vmem (!%p3069_p5), %s4273_s16, %s427_s30 [#allocation2]  }
  0x42   : > { %2981 = sbr.rel (%p3076_p6) target bundleno = 83 (0x53), region = 186  ;;  %s4105_s14 = smov (!%p3076_p6), %s431_s13  }
  0x43   : > { %s4109_s15 = smov (!%p3076_p6), %s4285_s9   ;;  %s4113_s0 = smov (!%p3076_p6), 0  }
  0x44   : > { %s4117_s21 = smov (!%p3076_p6), 0  }
  0x49 LB: >> { %v443_v0 = vld [vmem:[%s4111_s15] sm:$0xff]  ;;  %s447_s19 = sadd.s32 1, %s4115_s0  ;;  %s437_s21 = sadd.s32 1, %s4119_s21   ;;  %s4119_s21 = sphi %s4117_s21, %s437_s21   ;;  %s4115_s0 = sphi %s4113_s0, %s4114_s0   ;;  %s4111_s15 = sphi %s4109_s15, %s452_s15   ;;  %s4107_s14 = sphi %s4105_s14, %s453_s14  }
  0x4a   : >> { %v445_v1 = vld [vmem:[%s4111_s15 + $0x40] sm:$0xff]  ;;  %444 = vst [vmem:[%s4107_s14] sm:$0xff] %v443_v0  ;;  %p448_p7 = scmp.ge.s32.totalorder %s447_s19, %s4282_s20  ;;  %p436_p10 = scmp.ge.s32.totalorder %s437_s21, %s4282_s20 }
  0x4b   : >> { %446 = vst [vmem:[%s4107_s14 + $0x38] sm:$0xff] %v445_v1 }
  0x4c   : >> { %s5640_s19 = smov (%p448_p7, %s447_s19), 0  ;;  %439 = sbr.rel (!%p436_p10) target bundleno = 73 (0x49), region = 192 }
  0x4d   : >> { %s3077_s29 = sshll.u32 %s5640_s19, 3  ;;  %s4114_s0 = smov %s5640_s19  }
  0x4e   : >> { %s452_s15 = scalar_lea.vmem %s4285_s9, %s3077_s29   ;;  %s453_s14 = scalar_lea.vmem %s431_s13, %s3077_s29 [#allocation2]  }
  0x53 PF: > { %456 = sbr.rel (%p271_p4) target bundleno = 112 (0x70), region = 77  ;;  %s458_s0 = ssub.s32 (!%p271_p4), %s4271_s17, %s4277_s18 }
  0x54   : > { %s462_s7 = sshrl.u32 (!%p271_p4), %s4271_s17, 3  ;;  %s4299_s30 = scalar_lea.vmem (!%p271_p4), %s4269_s8, %s458_s0 }
  0x55   : > { %s4302_s14 = scalar_lea.vmem (!%p271_p4), %s4273_s16, %s458_s0 [#allocation2]  ;;  %s463_s21 = sshrl.u32 (!%p271_p4), %s462_s7, 5 }
  0x56   : > { %s4304_s15 = sand.u32 (!%p271_p4), 31, %s462_s7   ;;  %s3260_s20 = sshll.u32 (!%p271_p4), %s463_s21, 12 }
  0x57   : > { %s614_s9 = sshra.s32 (!%p271_p4), %s3260_s20, 4  ;;  %p3085_p11 = scmp.le.s32.totalorder (!%p271_p4), %s4304_s15, 0 }
  0x58   : > { %s4307_s13 = scalar_lea.vmem (!%p271_p4), %s4269_s8, %s614_s9   ;;  %s618_s19 = scalar_lea.vmem (!%p271_p4), %s4273_s16, %s614_s9 [#allocation2]  }
  0x5a   : > { %3009 = sbr.rel (%p3085_p11) target bundleno = 107 (0x6b), region = 208  ;;  %s4121_s29 = smov (!%p3085_p11), %s618_s19  }
  0x5b   : > { %s4125_s6 = smov (!%p3085_p11), %s4307_s13   ;;  %s4129_s25 = smov (!%p3085_p11), 0  }
  0x5c   : > { %s4133_s24 = smov (!%p3085_p11), 0  }
  0x61 LB: >> { %v630_v2 = vld [vmem:[%s4127_s6] sm:$0xff]  ;;  %s634_s0 = sadd.s32 1, %s4131_s25  ;;  %s624_s24 = sadd.s32 1, %s4135_s24   ;;  %s4135_s24 = sphi %s4133_s24, %s624_s24   ;;  %s4131_s25 = sphi %s4129_s25, %s4130_s25   ;;  %s4127_s6 = sphi %s4125_s6, %s639_s6   ;;  %s4123_s29 = sphi %s4121_s29, %s640_s29  }
  0x62   : >> { %v632_v3 = vld [vmem:[%s4127_s6 + $0x40] sm:$0xff]  ;;  %631 = vst [vmem:[%s4123_s29] sm:$0xff] %v630_v2  ;;  %p635_p13 = scmp.ge.s32.totalorder %s634_s0, %s4304_s15  ;;  %p623_p0 = scmp.ge.s32.totalorder %s624_s24, %s4304_s15 }
  0x63   : >> { %633 = vst [vmem:[%s4123_s29 + $0x38] sm:$0xff] %v632_v3 }
  0x64   : >> { %s5642_s0 = smov (%p635_p13, %s634_s0), 0  ;;  %626 = sbr.rel (!%p623_p0) target bundleno = 97 (0x61), region = 214 }
  0x65   : >> { %s3086_s7 = sshll.u32 %s5642_s0, 3  ;;  %s4130_s25 = smov %s5642_s0  }
  0x66   : >> { %s639_s6 = scalar_lea.vmem %s4307_s13, %s3086_s7   ;;  %s640_s29 = scalar_lea.vmem %s618_s19, %s3086_s7 [#allocation2]  }
  0x6b PF: > { %s4137_s21 = smov 0  }
  0x6c   : > { %s641_s25 = sshllo.u32 %s4137_s21, %s4277_s18 }
  0x6d   : > { %v650_v4 = vld [vmem:[%s4299_s30] sm:%s641_s25] }
  0x6e   : > { %v652_v5 = vld [vmem:[%s4299_s30 + $0x40] sm:%s641_s25]  ;;  %651 = vst [vmem:[%s4302_s14] sm:%s641_s25] %v650_v4 }
  0x6f   : > { %653 = vst [vmem:[%s4302_s14 + $0x38] sm:%s641_s25] %v652_v5 }
  0x70 PF: > { %p3088_p1 = scmp.ge.u32.totalorder %s4271_s17, 8 }
  0x71   : > { %s4138_s6 = smov (!%p3088_p1), 0  }
  0x72   : > { %256 = sbr.rel (%p3088_p1) target bundleno = 121 (0x79), region = 48  ;;  %s257_s24 = sshllo.u32 (!%p3088_p1), %s4138_s6, %s4271_s17 }
  0x73   : > { %v266_v6 = vld [vmem:[%s4269_s8] sm:%s257_s24] (!%p3088_p1) }
  0x74   : > { %v268_v7 = vld [vmem:[%s4269_s8 + $0x40] sm:%s257_s24] (!%p3088_p1)  ;;  %267 = vst [vmem:[%s4273_s16] sm:%s257_s24] (!%p3088_p1), %v266_v6 }
  0x75   : > { %269 = vst [vmem:[%s4273_s16 + $0x38] sm:%s257_s24] (!%p3088_p1), %v268_v7 }
  0x79 PF: > { %657 = sbr.rel (!%p4234_p3) target bundleno = 157 (0x9d), region = 102  ;;  %s658_s18 = sand.u32 (%p4234_p3), 1, %s4083_s23  }
  0x7a   : > { %s663_s30 = smul.u32 (%p4234_p3), 7, %s4095_s26  ;;  %s4336_s16 = scalar_lea.sflag (%p4234_p3), [#allocation4], %s658_s18 }
  0x7b   : > { %s3451_s14 = smul.u32 (%p4234_p3), 224, %s658_s18 }
  0x7c   : > { %s664_s15 = ssub.s32 (%p4234_p3), 8, %s663_s30 }
  0x7d   : > { %p665_p2 = scmp.lt.s32.totalorder (%p4234_p3), %s664_s15, 7  ;;  %s662_s20 = scalar_lea.vmem (%p4234_p3), [#allocation3], %s3451_s14 }
  0x80   : > { %s5644_s15 = smov (!%p665_p2, %s664_s15), 7 }
  0x81   : > { %s4333_s17 = sshll.u32 %s5644_s15, 9 }
  0x82   : > { %s669_s8 = ssub.s32 3584, %s4333_s17 }
  0x83   : > { %670 = vsyncadd %s4336_s16, %s669_s8  ;;  %p3090_p3 = scmp.ne.s32.totalorder %s4333_s17, 0  ;;  %s3091_s10 = sshll.u32 %s4099_s27, 5 }
  0x84   : > { %s673_s9 = sadd.s32 %s3091_s10, %s663_s30  ;;  %s3093_s13 = sshll.u32 %s5644_s15, 3 }
  0x85   : > { %s3092_s19 = sshll.u32 %s673_s9, 7  ;;  %s678_s29 = sshll.u32 %s662_s20, 4  ;;  %s4347_s29 = int_to_ptr.vmem [resolvable:$true] %s678_s29 }
  0x86   : > { %s4345_s21 = scalar_lea.hbm %s5543_s1, %s3092_s19  ;;  %s3917_s18 = scalar_lea.hbm %s5543_s1, 8192 }
  0x87   : > { %s3913_s25 = scalar_lea.hbm %s4345_s21, %s4333_s17  ;;  %p3918_p7 = scmp.lt.u32.totalorder %s4345_s21, %s5543_s1 }
  0x88   : > { %p3914_p4 = scmp.ne.s32.totalorder %s4345_s21, %s3913_s25  ;;  %p3919_p10 = scmp.lt.u32.totalorder %s3917_s18, %s3913_s25 }
  0x89   : > { %p3921_p13 = scmp.lt.u32.totalorder %s3913_s25, %s4345_s21 }
  0x8a   : > { %p3915_p5 = pnand %p3914_p4, %p3090_p3  ;;  %p3920_p11 = por %p3919_p10, %p3918_p7 }
  0x8c   : > { %p3916_p6 = pneg %p3915_p5  ;;  %p3922_p0 = por %p3921_p13, %p3920_p11 }
  0x8e   : > { %p3923_p1 = pnand %p3922_p0, %p3916_p6 }
  0x90   : > { %3926 = shalt.err (!%p3923_p1)
}
  0x91   : > { %s3927_s8 = scalar_lea.vmem %s4347_s29, %s4333_s17  ;;  %s4139_s20 = smov [#allocation3]  }
  0x92   : > { %p3928_p2 = scmp.ne.s32.totalorder %s4347_s29, %s3927_s8  ;;  %s3931_s10 = sshll.u32 %s4139_s20, 4  ;;  %s3932_s10 = int_to_ptr.vmem [resolvable:$false] %s3931_s10 }
  0x93   : > { %s3933_s9 = scalar_lea.vmem %s3932_s10, 7168  ;;  %p3934_p12 = scmp.lt.s32.totalorder %s4347_s29, %s3932_s10 }
  0x94   : > { %p3929_p4 = pnand %p3928_p2, %p3090_p3  ;;  %p3935_p7 = scmp.lt.s32.totalorder %s3933_s9, %s3927_s8 }
  0x96   : > { %p3930_p5 = pneg %p3929_p4  ;;  %p3936_p10 = por %p3935_p7, %p3934_p12 }
  0x98   : > { %p3937_p11 = pnand %p3936_p10, %p3930_p5 }
  0x9a   : > { %3940 = shalt.err (!%p3937_p11)
}
  0x9b   : > { %s4140_s19 = smov 1024   ;;  %s4141_s0 = smov 896  }
  0x9c   : > { %684 = dma.hbm_to_vmem [thread:$0]  (%p3090_p3), %s4345_s21, %s4333_s17, %s4347_s29, %s4336_s16, %s4140_s19, %s4141_s0, %s3093_s13  }
  0x9d PF: > { %p3096_p6 = scmp.ge.s32.totalorder %s4103_s28, 1  ;;  %p686_p13 = scmp.lt.s32.totalorder %s4103_s28, 5 }
  0x9f   : > { %p687_p12 = pnand %p3096_p6, %p686_p13 }
  0xa1   : > { %690 = sbr.rel (%p687_p12) target bundleno = 663 (0x297), region = 106 }
  0xa8   : > { %s4379_s7 = sand.u32 1, %s4079_s22  }
  0xa9   : > { %s3452_s25 = smul.u32 112, %s4379_s7  ;;  %s700_s17 = scalar_lea.sflag [#allocation4], %s4379_s7 }
  0xaa   : > { %s3453_s6 = smul.u32 224, %s4379_s7 }
  0xab   : > { %s4383_s15 = scalar_lea.vmem [#allocation2], %s3452_s25 }
  0xac   : > { %s4388_s16 = scalar_lea.vmem [#allocation3], %s3453_s6 }
  0xad   : > { %4066 = dma.done.wait (%p4242_p8), %s700_s17, 3584  }
  0xae   : > { %4068 = vsyncadd (%p4242_p8), %s700_s17, 4294963712  ;;  %v4142_v8 = vmov 0.0   ;;  %v4143_v9 = vmov 0   ;;  %v752_v10 = vld [vmem:[%s4383_s15 + $0x8] sm:$0xff]  ;;  %v759_v11 = vld [vmem:[%s4383_s15 + $0x40] sm:$0xff]  ;;  %vm805_vm0 = vcmask 130048  }
  0xaf   : > { %906 = vmatprep.mubr.f32.mxu0 %v4142_v8  ;;  %942 = vmatprep.mubr.f32.mxu1 %v4142_v8  ;;  %v751_v12 = vld [vmem:[%s4383_s15] sm:$0xff]  ;;  %v3344_v13 = vpack.c.bf16 %v759_v11, %v752_v10  ;;  %v758_v14 = vld [vmem:[%s4383_s15 + $0x38] sm:$0xff]  ;;  %v761_v17 = vld [vmem:[%s4383_s15 + $0x50] sm:$0xff]  ;;  %vm1390_vm1 = vcmask 261120   ;;  %s5120_s19 = scalar_lea.vmem [#allocation6], %s3453_s6  ;;  %s2844_s6 = scalar_lea.sflag [#allocation5], %s4379_s7 }
  0xb0   : > { %3661 = vset.pattern.permute.xlu0 %v4143_v9  ;;  %3662 = vset.pattern.permute.xlu1 %v4143_v9  ;;  %v3346_v15 = vpack.c.bf16 %v758_v14, %v751_v12  ;;  %v754_v16 = vld [vmem:[%s4383_s15 + $0x18] sm:$0xff]  ;;  %v753_v18 = vld [vmem:[%s4383_s15 + $0x10] sm:$0xff]  ;;  %v760_v20 = vld [vmem:[%s4383_s15 + $0x48] sm:$0xff]  ;;  %s5615_s0 = sld [smem:[#allocation10_spill]] (%p4246_p9) }
  0xb1   : > { %3345 = vmatprep.subr.bf16.mxu0 %v3344_v13  ;;  %3392 = vmatprep.subr.bf16.mxu1 %v3344_v13  ;;  %v3348_v19 = vpack.c.bf16 %v761_v17, %v754_v16  ;;  %v4407_v21 = vld [vmem:[%s5544_s2] sm:$0xff]  ;;  %v4412_v22 = vld [vmem:[%s5544_s2 + $0x30] sm:$0xff]  ;;  %v3350_v23 = vpack.c.bf16 %v760_v20, %v753_v18  ;;  %v756_v24 = vld [vmem:[%s4383_s15 + $0x28] sm:$0xff] }
  0xb2   : > { %3347 = vmatpush1.bf16.msra.mxu0 %v3346_v15  ;;  %3393 = vmatpush1.bf16.msra.mxu1 %v3346_v15  ;;  %v763_v25 = vld [vmem:[%s4383_s15 + $0x60] sm:$0xff]  ;;  %v762_v27 = vld [vmem:[%s4383_s15 + $0x58] sm:$0xff]  ;;  %v757_v32 = vld [vmem:[%s4383_s15 + $0x30] sm:$0xff] }
  0xb3   : > { %3349 = vmatprep.subr.bf16.mxu1 %v3348_v19  ;;  %v755_v26 = vld [vmem:[%s4383_s15 + $0x20] sm:$0xff]  ;;  %v3352_v28 = vpack.c.bf16 %v763_v25, %v756_v24  ;;  %v4425_v30 = vld [vmem:[%s5544_s2 + $0x8] sm:$0xff]  ;;  %v4430_v31 = vld [vmem:[%s5544_s2 + $0x38] sm:$0xff] }
  0xb4   : > { %v3354_v29 = vpack.c.bf16 %v762_v27, %v755_v26  ;;  %v764_v33 = vld [vmem:[%s4383_s15 + $0x68] sm:$0xff]  ;;  %v773_v36 = vld [vmem:[%s4388_s16 + $0x40] sm:$0xff]  ;;  %v4452_v39 = vld [vmem:[%s5544_s2 + $0x10] sm:$0xff] }
  0xb5   : > { %3097 = vmatmul.mubr.msk.f32.vlgmr.msra.gmra.mrb[0].mxu0 %vm805_vm0, %v4407_v21  ;;  %3103 = vmatmul.mubr.msk.f32.vlgmr.msra.gmra.mrb[0].mxu1 %vm805_vm0, %v4412_v22  ;;  %v766_v34 = vld [vmem:[%s4388_s16 + $0x8] sm:$0xff]  ;;  %v4437_v35 = vpack.c.bf16 %v764_v33, %v757_v32  ;;  %v1963_v38 = vld [vmem:[%s5546_s4] sm:$0xff]  ;;  %v1965_v41 = vld [vmem:[%s5546_s4 + $0x10] sm:$0xff] }
  0xb6   : > { %3351 = vmatpush1.bf16.msra.mxu1 %v3350_v23  ;;  %912 = vmatprep.mubr.f32.mxu0 %v4142_v8  ;;  %v3360_v37 = vpack.c.bf16 %v773_v36, %v766_v34  ;;  %v4457_v40 = vld [vmem:[%s5544_s2 + $0x40] sm:$0xff]  ;;  %v1964_v42 = vld [vmem:[%s5546_s4 + $0x8] sm:$0xff]  ;;  %v1966_v43 = vld [vmem:[%s5546_s4 + $0x18] sm:$0xff]  ;;  %s2851_s25 = smul.u32 (%p4246_p9), 7, %s5615_s0 }
  0xb7   : > { %948 = vmatprep.mubr.f32.mxu1 %v4142_v8  ;;  %3353 = vmatprep.subr.bf16.mxu0 %v3352_v28  ;;  %v4478_v44 = vld [vmem:[%s5544_s2 + $0x18] sm:$0xff]  ;;  %v4483_v45 = vld [vmem:[%s5544_s2 + $0x48] sm:$0xff]  ;;  %v1967_v46 = vld [vmem:[%s5546_s4 + $0x20] sm:$0xff] }
  0xb8   : > { %3355 = vmatpush1.bf16.msra.mxu0 %v3354_v29  ;;  %3357 = vmatprep.subr.bf16.mxu1 %v4437_v35  ;;  %v1968_v47 = vld [vmem:[%s5546_s4 + $0x28] sm:$0xff]  ;;  %v4500_v48 = vld [vmem:[%s5544_s2 + $0x20] sm:$0xff]  ;;  %v4505_v49 = vld [vmem:[%s5544_s2 + $0x50] sm:$0xff]  ;;  %s2852_s15 = ssub.s32 (%p4246_p9), 8, %s2851_s25 }
  0xb9   : > { %3098 = vmatmul.mubr.msk.f32.gmra.mrb[2].mxu0 %vm805_vm0, %v4425_v30  ;;  %3104 = vmatmul.mubr.msk.f32.gmra.mrb[2].mxu1 %vm805_vm0, %v4430_v31  ;;  %v1969_v50 = vld [vmem:[%s5546_s4 + $0x30] sm:$0xff]  ;;  %v1970_v51 = vld [vmem:[%s5546_s4 + $0x38] sm:$0xff]  ;;  %v4522_v52 = vld [vmem:[%s5544_s2 + $0x28] sm:$0xff]  ;;  %p2853_p8 = scmp.lt.s32.totalorder (%p4246_p9), %s2852_s15, 7 }
  0xba   : > { %918 = vmatprep.mubr.f32.mxu0 %v4142_v8  ;;  %954 = vmatprep.mubr.f32.mxu1 %v4142_v8  ;;  %v4527_v53 = vld [vmem:[%s5544_s2 + $0x58] sm:$0xff]  ;;  %v4530_v54 = vld [vmem:[%s4388_s16] sm:$0xff]  ;;  %v787_v57 = vld [vmem:[%s4388_s16 + $0xb0] sm:$0xff] }
  0xbb   : > { %3361 = vmatprep.subr.bf16.mxu0 %v3360_v37  ;;  %2009 = vperm.xlu0 %3661, %v1963_v38   ;;  %v4533_v55 = vld [vmem:[%s4388_s16 + $0x38] sm:$0xff]  ;;  %v775_v59 = vld [vmem:[%s4388_s16 + $0x50] sm:$0xff]  ;;  %v1975_v60 = vld [vmem:[%s5547_s5] sm:$0xff] }
  0xbc   : > { %2019 = vperm.xlu1 %3662, %v1965_v41   ;;  %v780_v56 = vld [vmem:[%s4388_s16 + $0x78] sm:$0xff]  ;;  %v1976_v61 = vld [vmem:[%s5547_s5 + $0x8] sm:$0xff]  ;;  %v3362_v62 = vpack.c.bf16 %v4533_v55, %v4530_v54  ;;  %v779_v0 = vld [vmem:[%s4388_s16 + $0x70] sm:$0xff] }
  0xbd   : > { %3099 = vmatmul.mubr.msk.f32.gmra.mrb[4].mxu0 %vm805_vm0, %v4452_v39  ;;  %3105 = vmatmul.mubr.msk.f32.gmra.mrb[4].mxu1 %vm805_vm0, %v4457_v40  ;;  %v768_v58 = vld [vmem:[%s4388_s16 + $0x18] sm:$0xff]  ;;  %v3364_v63 = vpack.c.bf16 %v787_v57, %v780_v56  ;;  %v786_v1 = vld [vmem:[%s4388_s16 + $0xa8] sm:$0xff]  ;;  %v777_v4 = vld [vmem:[%s4388_s16 + $0x60] sm:$0xff] }
  0xbe   : > { %924 = vmatprep.mubr.f32.mxu0 %v4142_v8  ;;  %960 = vmatprep.mubr.f32.mxu1 %v4142_v8  ;;  %v3368_v2 = vpack.c.bf16 %v775_v59, %v768_v58  ;;  %v770_v3 = vld [vmem:[%s4388_s16 + $0x28] sm:$0xff]  ;;  %v3366_v5 = vpack.c.bf16 %v786_v1, %v779_v0  ;;  %v1977_v7 = vld [vmem:[%s5547_s5 + $0x10] sm:$0xff]  ;;  %v1978_v9 = vld [vmem:[%s5547_s5 + $0x18] sm:$0xff] }
  0xbf   : > { %2014 = vperm.xlu0 %3661, %v1964_v42   ;;  %v3376_v6 = vpack.c.bf16 %v777_v4, %v770_v3  ;;  %v1971_v10 = vld [vmem:[%s5546_s4 + $0x40] sm:$0xff]  ;;  %v1972_v11 = vld [vmem:[%s5546_s4 + $0x48] sm:$0xff]  ;;  %v1973_v12 = vld [vmem:[%s5546_s4 + $0x50] sm:$0xff] }
  0xc0   : > { %2024 = vperm.xlu1 %3662, %v1966_v43   ;;  %v1974_v13 = vld [vmem:[%s5546_s4 + $0x58] sm:$0xff]  ;;  %v767_v14 = vld [vmem:[%s4388_s16 + $0x10] sm:$0xff]  ;;  %v774_v15 = vld [vmem:[%s4388_s16 + $0x48] sm:$0xff] }
  0xc1   : > { %3100 = vmatmul.mubr.msk.f32.gmra.mrb[6].mxu0 %vm805_vm0, %v4478_v44  ;;  %3106 = vmatmul.mubr.msk.f32.gmra.mrb[6].mxu1 %vm805_vm0, %v4483_v45  ;;  %v769_v16 = vld [vmem:[%s4388_s16 + $0x20] sm:$0xff]  ;;  %v776_v17 = vld [vmem:[%s4388_s16 + $0x58] sm:$0xff]  ;;  %v782_v18 = vld [vmem:[%s4388_s16 + $0x88] sm:$0xff]  ;;  %v3370_v25 = vpack.c.bf16 %v774_v15, %v767_v14 }
  0xc2   : > { %930 = vmatprep.mubr.f32.mxu0 %v4142_v8  ;;  %966 = vmatprep.mubr.f32.mxu1 %v4142_v8  ;;  %v789_v19 = vld [vmem:[%s4388_s16 + $0xc0] sm:$0xff]  ;;  %v784_v20 = vld [vmem:[%s4388_s16 + $0x98] sm:$0xff]  ;;  %v791_v23 = vld [vmem:[%s4388_s16 + $0xd0] sm:$0xff]  ;;  %v3378_v26 = vpack.c.bf16 %v776_v17, %v769_v16 }
  0xc3   : > { %2253 = vperm.xlu0 %3661, %v1967_v46   ;;  %v4660_v24 = vld [vmem:[%s5545_s3] sm:$0xff]  ;;  %v3372_v28 = vpack.c.bf16 %v789_v19, %v782_v18  ;;  %v788_v29 = vld [vmem:[%s4388_s16 + $0xb8] sm:$0xff]  ;;  %v3380_v32 = vpack.c.bf16 %v791_v23, %v784_v20  ;;  %v783_v33 = vld [vmem:[%s4388_s16 + $0x90] sm:$0xff] }
  0xc4   : > { %2258 = vperm.xlu1 %3662, %v1968_v47   ;;  %v781_v27 = vld [vmem:[%s4388_s16 + $0x80] sm:$0xff]  ;;  %v790_v34 = vld [vmem:[%s4388_s16 + $0xc8] sm:$0xff]  ;;  %v4702_v41 = vld [vmem:[%s5545_s3 + $0x18] sm:$0xff] }
  0xc5   : > { %3101 = vmatmul.mubr.msk.f32.gmra.mrb[8].mxu0 %vm805_vm0, %v4500_v48  ;;  %3107 = vmatmul.mubr.msk.f32.gmra.mrb[8].mxu1 %vm805_vm0, %v4505_v49  ;;  %v4677_v36 = vld [vmem:[%s5545_s3 + $0x8] sm:$0xff]  ;;  %v3374_v37 = vpack.c.bf16 %v788_v29, %v781_v27  ;;  %v3382_v38 = vpack.c.bf16 %v790_v34, %v783_v33  ;;  %v792_v42 = vld [vmem:[%s4388_s16 + $0xd8] sm:$0xff]  ;;  %v4739_v43 = vld [vmem:[%s5545_s3 + $0x30] sm:$0xff] }
  0xc6   : > { %936 = vmatprep.mubr.f32.mxu0 %v4142_v8  ;;  %972 = vmatprep.mubr.f32.mxu1 %v4142_v8  ;;  %v1386_v46 = vld [vmem:[%s5545_s3 + $0x40] sm:$0xff]  ;;  %v1387_v47 = vld [vmem:[%s5545_s3 + $0x48] sm:$0xff] }
  0xc7   : > { %2263 = vperm.xlu0 %3661, %v1969_v50  }
  0xc8   : > { %2268 = vperm.xlu1 %3662, %v1970_v51  }
  0xc9   : > { %3102 = vmatmul.mubr.msk.f32.gmra.mrb[10].mxu0 %vm805_vm0, %v4522_v52  ;;  %3108 = vmatmul.mubr.msk.f32.gmra.mrb[10].mxu1 %vm805_vm0, %v4527_v53 }
  0xca   : > { %1043 = vmatprep.mubr.f32.mxu1 %v4142_v8  ;;  %1180 = vmatprep.mubr.f32.mxu0 %v4142_v8 }
  0xcb   : > { %2517 = vperm.xlu0 %3661, %v1975_v60  }
  0xcc   : > { %2522 = vperm.xlu1 %3662, %v1976_v61  }
  0xcd   : > { %3109 = vmatmul.mubr.msk.f32.vlgmr.msra.gmra.mrb[12].mxu1 %vm805_vm0, %v4407_v21  ;;  %3121 = vmatmul.mubr.msk.f32.vlgmr.msra.gmra.mrb[12].mxu0 %vm805_vm0, %v4407_v21 }
  0xce   : > { %3359 = vmatpush3.bf16.msra.mxu1 %v4437_v35  ;;  %1049 = vmatprep.mubr.f32.mxu1 %v4142_v8  ;;  %v778_v35 = vld [vmem:[%s4388_s16 + $0x68] sm:$0xff] }
  0xcf   : > { %1186 = vmatprep.mubr.f32.mxu0 %v4142_v8  ;;  %3363 = vmatpush1.bf16.msra.mxu0 %v3362_v62 }
  0xd0   : > { %3365 = vmatprep.subr.bf16.mxu0 %v3364_v63  ;;  %3369 = vmatprep.subr.bf16.mxu1 %v3368_v2 }
  0xd1   : > { %3110 = vmatmul.mubr.msk.f32.gmra.mrb[14].mxu1 %vm805_vm0, %v4425_v30  ;;  %3122 = vmatmul.mubr.msk.f32.gmra.mrb[14].mxu0 %vm805_vm0, %v4425_v30 }
  0xd2   : > { %1055 = vmatprep.mubr.f32.mxu1 %v4142_v8  ;;  %1192 = vmatprep.mubr.f32.mxu0 %v4142_v8 }
  0xd3   : > { %3367 = vmatpush1.bf16.msra.mxu0 %v3366_v5  ;;  %2527 = vperm.xlu0 %3661, %v1977_v7  }
  0xd4   : > { %3377 = vmatprep.subr.bf16.mxu0 %v3376_v6  ;;  %2532 = vperm.xlu1 %3662, %v1978_v9  }
  0xd5   : > { %3111 = vmatmul.mubr.msk.f32.gmra.mrb[16].mxu1 %vm805_vm0, %v4452_v39  ;;  %3123 = vmatmul.mubr.msk.f32.gmra.mrb[16].mxu0 %vm805_vm0, %v4452_v39 }
  0xd6   : > { %1061 = vmatprep.mubr.f32.mxu1 %v4142_v8  ;;  %1198 = vmatprep.mubr.f32.mxu0 %v4142_v8 }
  0xd7   : > { %2469 = vperm.xlu0 %3661, %v1971_v10  }
  0xd8   : > { %2474 = vperm.xlu1 %3662, %v1972_v11  }
  0xd9   : > { %3112 = vmatmul.mubr.msk.f32.gmra.mrb[18].mxu1 %vm805_vm0, %v4478_v44  ;;  %3124 = vmatmul.mubr.msk.f32.gmra.mrb[18].mxu0 %vm805_vm0, %v4478_v44 }
  0xda   : > { %1067 = vmatprep.mubr.f32.mxu1 %v4142_v8  ;;  %1204 = vmatprep.mubr.f32.mxu0 %v4142_v8 }
  0xdb   : > { %2479 = vperm.xlu0 %3661, %v1973_v12  }
  0xdc   : > { %2484 = vperm.xlu1 %3662, %v1974_v13  }
  0xdd   : > { %3113 = vmatmul.mubr.msk.f32.gmra.mrb[20].mxu1 %vm805_vm0, %v4500_v48  ;;  %3125 = vmatmul.mubr.msk.f32.gmra.mrb[20].mxu0 %vm805_vm0, %v4500_v48 }
  0xde   : > { %1073 = vmatprep.mubr.f32.mxu1 %v4142_v8  ;;  %1210 = vmatprep.mubr.f32.mxu0 %v4142_v8 }
  0xe1   : > { %3114 = vmatmul.mubr.msk.f32.gmra.mrb[22].mxu1 %vm805_vm0, %v4522_v52  ;;  %3126 = vmatmul.mubr.msk.f32.gmra.mrb[22].mxu0 %vm805_vm0, %v4522_v52 }
  0xe2   : > { %1079 = vmatprep.mubr.f32.mxu1 %v4142_v8  ;;  %1216 = vmatprep.mubr.f32.mxu0 %v4142_v8 }
  0xe5   : > { %3115 = vmatmul.mubr.msk.f32.gmra.mrb[24].mxu1 %vm805_vm0, %v4412_v22  ;;  %3127 = vmatmul.mubr.msk.f32.gmra.mrb[24].mxu0 %vm805_vm0, %v4412_v22 }
  0xe6   : > { %1085 = vmatprep.mubr.f32.mxu1 %v4142_v8  ;;  %1222 = vmatprep.mubr.f32.mxu0 %v4142_v8 }
  0xe9   : > { %3116 = vmatmul.mubr.msk.f32.gmra.mrb[26].mxu1 %vm805_vm0, %v4430_v31  ;;  %3128 = vmatmul.mubr.msk.f32.gmra.mrb[26].mxu0 %vm805_vm0, %v4430_v31 }
  0xea   : > { %1091 = vmatprep.mubr.f32.mxu1 %v4142_v8  ;;  %1228 = vmatprep.mubr.f32.mxu0 %v4142_v8 }
  0xed   : > { %3117 = vmatmul.mubr.msk.f32.gmra.mrb[28].mxu1 %vm805_vm0, %v4457_v40  ;;  %3129 = vmatmul.mubr.msk.f32.gmra.mrb[28].mxu0 %vm805_vm0, %v4457_v40 }
  0xee   : > { %1097 = vmatprep.mubr.f32.mxu1 %v4142_v8  ;;  %1234 = vmatprep.mubr.f32.mxu0 %v4142_v8 }
  0xf1   : > { %3118 = vmatmul.mubr.msk.f32.gmra.mrb[30].mxu1 %vm805_vm0, %v4483_v45  ;;  %3130 = vmatmul.mubr.msk.f32.gmra.mrb[30].mxu0 %vm805_vm0, %v4483_v45 }
  0xf2   : > { %1103 = vmatprep.mubr.f32.mxu1 %v4142_v8  ;;  %1240 = vmatprep.mubr.f32.mxu0 %v4142_v8 }
  0xf5   : > { %3119 = vmatmul.mubr.msk.f32.gmra.mrb[32].mxu1 %vm805_vm0, %v4505_v49  ;;  %3131 = vmatmul.mubr.msk.f32.gmra.mrb[32].mxu0 %vm805_vm0, %v4505_v49 }
  0xf6   : > { %1109 = vmatprep.mubr.f32.mxu1 %v4142_v8  ;;  %1246 = vmatprep.mubr.f32.mxu0 %v4142_v8 }
  0xf9   : > { %3120 = vmatmul.mubr.msk.f32.gmra.mrb[34].mxu1 %vm805_vm0, %v4527_v53  ;;  %3132 = vmatmul.mubr.msk.f32.gmra.mrb[34].mxu0 %vm805_vm0, %v4527_v53 }
  0xfa   : > { %3300 = vmatprep.mubr.msk.f32.mxu1 %vm805_vm0, %v4407_v21  ;;  %1491 = vmatprep.mubr.f32.mxu0 %v4142_v8  ;;  %v771_v21 = vld [vmem:[%s4388_s16 + $0x30] sm:$0xff] }
  0xfd   : > { %3301 = vmatmul.mubr.msk.f32.vlgmr.msra.gmra.mrb[36].mxu1 %vm805_vm0, %v4425_v30  ;;  %3145 = vmatmul.mubr.msk.f32.vlgmr.msra.gmra.mrb[0].mxu0 %vm1390_vm1, %v4660_v24  ;;  %v3384_v30 = vpack.c.bf16 %v778_v35, %v771_v21 }
  0xfe   : > { %3371 = vmatpush1.bf16.msra.mxu1 %v3370_v25  ;;  %3303 = vmatprep.mubr.msk.f32.mxu1 %vm805_vm0, %v4452_v39  ;;  %v4690_v39 = vld [vmem:[%s5545_s3 + $0x10] sm:$0xff] }
  0xff   : > { %1497 = vmatprep.mubr.f32.mxu0 %v4142_v8  ;;  %3379 = vmatpush1.bf16.msra.mxu0 %v3378_v26 }
 0x100   : > { %3373 = vmatprep.subr.bf16.mxu1 %v3372_v28  ;;  %3381 = vmatprep.subr.bf16.mxu0 %v3380_v32 }
 0x101   : > { %3304 = vmatmul.mubr.msk.f32.gmra.mrb[38].mxu1 %vm805_vm0, %v4478_v44  ;;  %3146 = vmatmul.mubr.msk.f32.gmra.mrb[2].mxu0 %vm1390_vm1, %v4677_v36 }
 0x102   : > { %3306 = vmatprep.mubr.msk.f32.mxu1 %vm805_vm0, %v4500_v48  ;;  %1503 = vmatprep.mubr.f32.mxu0 %v4142_v8  ;;  %v1388_v48 = vld [vmem:[%s5545_s3 + $0x50] sm:$0xff] }
 0x103   : > { %3375 = vmatpush1.bf16.msra.mxu1 %v3374_v37  ;;  %3383 = vmatpush1.bf16.msra.mxu0 %v3382_v38 }
 0x104   : > { %3385 = vmatprep.subr.bf16.mxu1 %v3384_v30 }
 0x105   : > { %3307 = vmatmul.mubr.msk.f32.gmra.mrb[40].mxu1 %vm805_vm0, %v4522_v52  ;;  %3147 = vmatmul.mubr.msk.f32.gmra.mrb[4].mxu0 %vm1390_vm1, %v4690_v39 }
 0x106   : > { %3309 = vmatprep.mubr.msk.f32.mxu1 %vm805_vm0, %v4412_v22  ;;  %1509 = vmatprep.mubr.f32.mxu0 %v4142_v8  ;;  %v4714_v22 = vld [vmem:[%s5545_s3 + $0x20] sm:$0xff] }
 0x109   : > { %3310 = vmatmul.mubr.msk.f32.gmra.mrb[42].mxu1 %vm805_vm0, %v4430_v31  ;;  %3148 = vmatmul.mubr.msk.f32.gmra.mrb[6].mxu0 %vm1390_vm1, %v4702_v41  ;;  %v4726_v31 = vld [vmem:[%s5545_s3 + $0x28] sm:$0xff] }
 0x10a   : > { %3312 = vmatprep.mubr.msk.f32.mxu1 %vm805_vm0, %v4457_v40  ;;  %1515 = vmatprep.mubr.f32.mxu0 %v4142_v8  ;;  %v785_v40 = vld [vmem:[%s4388_s16 + $0xa0] sm:$0xff] }
 0x10b   : > { %v3388_v44 = vpack.c.bf16 %v792_v42, %v785_v40 }
 0x10d   : > { %3313 = vmatmul.mubr.msk.f32.gmra.mrb[44].mxu1 %vm805_vm0, %v4483_v45  ;;  %3149 = vmatmul.mubr.msk.f32.gmra.mrb[8].mxu0 %vm1390_vm1, %v4714_v22  ;;  %v4749_v45 = vld [vmem:[%s5545_s3 + $0x38] sm:$0xff] }
 0x10e   : > { %3315 = vmatprep.mubr.msk.f32.mxu1 %vm805_vm0, %v4505_v49  ;;  %1521 = vmatprep.mubr.f32.mxu0 %v4142_v8  ;;  %v1389_v49 = vld [vmem:[%s5545_s3 + $0x58] sm:$0xff] }
 0x111   : > { %3316 = vmatmul.mubr.msk.f32.gmra.mrb[46].mxu1 %vm805_vm0, %v4527_v53  ;;  %3150 = vmatmul.mubr.msk.f32.gmra.mrb[10].mxu0 %vm1390_vm1, %v4726_v31 }
 0x112   : > { %1527 = vmatprep.mubr.f32.mxu0 %v4142_v8  ;;  %1628 = vmatprep.mubr.f32.mxu1 %v4142_v8 }
 0x115   : > { %3151 = vmatmul.mubr.msk.f32.gmra.mrb[36].mxu0 %vm1390_vm1, %v4739_v43  ;;  %3157 = vmatmul.mubr.msk.f32.vlgmr.msra.gmra.mrb[12].mxu1 %vm1390_vm1, %v4660_v24 }
 0x116   : > { %3387 = vmatpush3.bf16.msra.mxu1 %v3384_v30  ;;  %1533 = vmatprep.mubr.f32.mxu0 %v4142_v8 }
 0x117   : > { %1634 = vmatprep.mubr.f32.mxu1 %v4142_v8  ;;  %3389 = vmatprep.subr.bf16.mxu1 %v3388_v44 }
 0x119   : > { %3152 = vmatmul.mubr.msk.f32.gmra.mrb[38].mxu0 %vm1390_vm1, %v4749_v45  ;;  %3158 = vmatmul.mubr.msk.f32.gmra.mrb[14].mxu1 %vm1390_vm1, %v4677_v36 }
 0x11a   : > { %1539 = vmatprep.mubr.f32.mxu0 %v4142_v8  ;;  %1640 = vmatprep.mubr.f32.mxu1 %v4142_v8 }
 0x11b   : > { %3391 = vmatpush3.bf16.msra.mxu1 %v3388_v44 }
 0x11d   : > { %3153 = vmatmul.mubr.msk.f32.gmra.mrb[40].mxu0 %vm1390_vm1, %v1386_v46  ;;  %3159 = vmatmul.mubr.msk.f32.gmra.mrb[16].mxu1 %vm1390_vm1, %v4690_v39 }
 0x11e   : > { %1545 = vmatprep.mubr.f32.mxu0 %v4142_v8  ;;  %1646 = vmatprep.mubr.f32.mxu1 %v4142_v8 }
 0x121   : > { %3154 = vmatmul.mubr.msk.f32.gmra.mrb[42].mxu0 %vm1390_vm1, %v1387_v47  ;;  %3160 = vmatmul.mubr.msk.f32.gmra.mrb[18].mxu1 %vm1390_vm1, %v4702_v41 }
 0x122   : > { %1551 = vmatprep.mubr.f32.mxu0 %v4142_v8  ;;  %1652 = vmatprep.mubr.f32.mxu1 %v4142_v8 }
 0x125   : > { %3155 = vmatmul.mubr.msk.f32.gmra.mrb[44].mxu0 %vm1390_vm1, %v1388_v48  ;;  %3161 = vmatmul.mubr.msk.f32.gmra.mrb[20].mxu1 %vm1390_vm1, %v4714_v22 }
 0x126   : > { %1557 = vmatprep.mubr.f32.mxu0 %v4142_v8  ;;  %1658 = vmatprep.mubr.f32.mxu1 %v4142_v8 }
 0x129   : > { %3156 = vmatmul.mubr.msk.f32.gmra.mrb[46].mxu0 %vm1390_vm1, %v1389_v49  ;;  %3162 = vmatmul.mubr.msk.f32.gmra.mrb[22].mxu1 %vm1390_vm1, %v4726_v31 }
 0x12a   : > { %1664 = vmatprep.mubr.f32.mxu1 %v4142_v8  ;;  %1765 = vmatprep.mubr.f32.mxu0 %v4142_v8 }
 0x12d   : > { %3163 = vmatmul.mubr.msk.f32.gmra.mrb[24].mxu1 %vm1390_vm1, %v4739_v43  ;;  %3169 = vmatmul.mubr.msk.f32.vlgmr.msra.gmra.mrb[12].mxu0 %vm1390_vm1, %v4660_v24 }
 0x12e   : > { %1670 = vmatprep.mubr.f32.mxu1 %v4142_v8  ;;  %1771 = vmatprep.mubr.f32.mxu0 %v4142_v8 }
 0x131   : > { %3164 = vmatmul.mubr.msk.f32.gmra.mrb[26].mxu1 %vm1390_vm1, %v4749_v45  ;;  %3170 = vmatmul.mubr.msk.f32.gmra.mrb[14].mxu0 %vm1390_vm1, %v4677_v36 }
 0x132   : > { %1676 = vmatprep.mubr.f32.mxu1 %v4142_v8  ;;  %1777 = vmatprep.mubr.f32.mxu0 %v4142_v8 }
 0x135   : > { %3165 = vmatmul.mubr.msk.f32.gmra.mrb[48].mxu1 %vm1390_vm1, %v1386_v46  ;;  %3171 = vmatmul.mubr.msk.f32.gmra.mrb[16].mxu0 %vm1390_vm1, %v4690_v39 }
 0x136   : > { %1682 = vmatprep.mubr.f32.mxu1 %v4142_v8  ;;  %1783 = vmatprep.mubr.f32.mxu0 %v4142_v8 }
 0x139   : > { %3166 = vmatmul.mubr.msk.f32.gmra.mrb[50].mxu1 %vm1390_vm1, %v1387_v47  ;;  %3172 = vmatmul.mubr.msk.f32.gmra.mrb[18].mxu0 %vm1390_vm1, %v4702_v41 }
 0x13a   : > { %1688 = vmatprep.mubr.f32.mxu1 %v4142_v8  ;;  %1789 = vmatprep.mubr.f32.mxu0 %v4142_v8  ;;  %v4874_v63 = vpop.permute.xlu0 %2009 }
 0x13b   : > { %v4876_v0 = vpop.permute.xlu1 %2019 }
 0x13d   : > { %3167 = vmatmul.mubr.msk.f32.gmra.mrb[52].mxu1 %vm1390_vm1, %v1388_v48  ;;  %3173 = vmatmul.mubr.msk.f32.gmra.mrb[20].mxu0 %vm1390_vm1, %v4714_v22 }
 0x13e   : > { %1694 = vmatprep.mubr.f32.mxu1 %v4142_v8  ;;  %1795 = vmatprep.mubr.f32.mxu0 %v4142_v8  ;;  %v4878_v1 = vpop.permute.xlu0 %2014 }
 0x13f   : > { %v4880_v2 = vpop.permute.xlu1 %2024 }
 0x141   : > { %3168 = vmatmul.mubr.msk.f32.gmra.mrb[54].mxu1 %vm1390_vm1, %v1389_v49  ;;  %3174 = vmatmul.mubr.msk.f32.gmra.mrb[22].mxu0 %vm1390_vm1, %v4726_v31 }
 0x142   : > { %1801 = vmatprep.mubr.f32.mxu0 %v4142_v8  ;;  %3326 = vmatprep.mubr.msk.f32.mxu1 %vm1390_vm1, %v4660_v24  ;;  %v4882_v3 = vpop.permute.xlu0 %2253 }
 0x143   : > { %v4884_v4 = vpop.permute.xlu1 %2258 }
 0x145   : > { %3175 = vmatmul.mubr.msk.f32.gmra.mrb[24].mxu0 %vm1390_vm1, %v4739_v43  ;;  %3327 = vmatmul.mubr.msk.f32.vlgmr.msra.gmra.mrb[36].mxu1 %vm1390_vm1, %v4677_v36 }
 0x146   : > { %1807 = vmatprep.mubr.f32.mxu0 %v4142_v8  ;;  %3329 = vmatprep.mubr.msk.f32.mxu1 %vm1390_vm1, %v4690_v39  ;;  %v4892_v10 = vpop.permute.xlu0 %2263 }
 0x147   : > { %v4894_v11 = vpop.permute.xlu1 %2268 }
 0x149   : > { %3176 = vmatmul.mubr.msk.f32.gmra.mrb[26].mxu0 %vm1390_vm1, %v4749_v45  ;;  %3330 = vmatmul.mubr.msk.f32.gmra.mrb[38].mxu1 %vm1390_vm1, %v4702_v41 }
 0x14a   : > { %1813 = vmatprep.mubr.f32.mxu0 %v4142_v8  ;;  %3332 = vmatprep.mubr.msk.f32.mxu1 %vm1390_vm1, %v4714_v22  ;;  %v4912_v20 = vpop.permute.xlu0 %2517 }
 0x14b   : > { %v4914_v23 = vpop.permute.xlu1 %2522 }
 0x14c   : > { %5573 = vst [vmem:[#allocation16_spill] sm:$0xff] %v4914_v23 }
 0x14d   : > { %3177 = vmatmul.mubr.msk.f32.gmra.mrb[48].mxu0 %vm1390_vm1, %v1386_v46  ;;  %3333 = vmatmul.mubr.msk.f32.gmra.mrb[40].mxu1 %vm1390_vm1, %v4726_v31 }
 0x14e   : > { %1819 = vmatprep.mubr.f32.mxu0 %v4142_v8  ;;  %3335 = vmatprep.mubr.msk.f32.mxu1 %vm1390_vm1, %v4739_v43 }
 0x151   : > { %3178 = vmatmul.mubr.msk.f32.gmra.mrb[50].mxu0 %vm1390_vm1, %v1387_v47  ;;  %3336 = vmatmul.mubr.msk.f32.gmra.mrb[42].mxu1 %vm1390_vm1, %v4749_v45 }
 0x152   : > { %1825 = vmatprep.mubr.f32.mxu0 %v4142_v8  ;;  %3338 = vmatprep.mubr.msk.f32.mxu1 %vm1390_vm1, %v1386_v46  ;;  %v4924_v29 = vpop.permute.xlu0 %2527 }
 0x153   : > { %v4927_v34 = vpop.permute.xlu1 %2532 }
 0x155   : > { %3179 = vmatmul.mubr.msk.f32.gmra.mrb[52].mxu0 %vm1390_vm1, %v1388_v48  ;;  %3339 = vmatmul.mubr.msk.f32.gmra.mrb[56].mxu1 %vm1390_vm1, %v1387_v47 }
 0x156   : > { %1831 = vmatprep.mubr.f32.mxu0 %v4142_v8  ;;  %3341 = vmatprep.mubr.msk.f32.mxu1 %vm1390_vm1, %v1388_v48  ;;  %v4932_v41 = vpop.permute.xlu0 %2469 }
 0x157   : > { %5574 = vst [vmem:[#allocation17_spill] sm:$0xff] %v4932_v41  ;;  %v4934_v31 = vpop.permute.xlu1 %2474 }
 0x159   : > { %3180 = vmatmul.mubr.msk.f32.gmra.mrb[54].mxu0 %vm1390_vm1, %v1389_v49  ;;  %3342 = vmatmul.mubr.msk.f32.gmra.mrb[58].mxu1 %vm1390_vm1, %v1389_v49 }
 0x15a   : > { %v4938_v46 = vpop.permute.xlu0 %2479 }
 0x15b   : > { %5575 = vst [vmem:[#allocation18_spill] sm:$0xff] %v4938_v46  ;;  %v4943_v49 = vpop.permute.xlu1 %2484 }
 0x15c   : > { %5576 = vst [vmem:[#allocation19_spill] sm:$0xff] %v4943_v49 }
 0x188   : > { %v4854_v50 = vpop.f32.mrb[0].mxu1 }
 0x189   : > { %v4856_v51 = vpop.f32.mrb[1].mxu1 }
 0x18c   : > { %v4858_v52 = vpop.f32.mrb[2].mxu1 }
 0x18d   : > { %v4860_v53 = vpop.f32.mrb[3].mxu1 }
 0x190   : > { %v4862_v56 = vpop.f32.mrb[4].mxu1 }
 0x191   : > { %v958_v57 = vpop.f32.mrb[5].mxu1 }
 0x192   : > { %v4941_v48 = vadd.f32 %v4932_v41, %v958_v57 }
 0x194   : > { %v4864_v58 = vpop.f32.mrb[6].mxu1 }
 0x195   : > { %v964_v8 = vpop.f32.mrb[7].mxu1 }
 0x198   : > { %v4866_v59 = vpop.f32.mrb[8].mxu1 }
 0x199   : > { %v4868_v60 = vpop.f32.mrb[9].mxu1 }
 0x19a   : > { %v4959_v57 = vadd.f32 %v4938_v46, %v4868_v60 }
 0x19c   : > { %v4870_v61 = vpop.f32.mrb[10].mxu1 }
 0x19d   : > { %v4872_v62 = vpop.f32.mrb[11].mxu1  ;;  %v4975_v60 = vadd.f32 %v4943_v49, %v4870_v61 }
 0x1c0   : > { %v1093_v5 = vpop.f32.mrb[28].mxu1  ;;  %v4886_v6 = vpop.f32.mrb[28].mxu0 }
 0x1c1   : > { %v4888_v7 = vpop.f32.mrb[29].mxu1  ;;  %v4890_v9 = vpop.f32.mrb[29].mxu0 }
 0x1c4   : > { %v4896_v12 = vpop.f32.mrb[30].mxu1  ;;  %v4898_v13 = vpop.f32.mrb[30].mxu0 }
 0x1c5   : > { %v4900_v14 = vpop.f32.mrb[31].mxu1  ;;  %v4902_v15 = vpop.f32.mrb[31].mxu0 }
 0x1c8   : > { %v4904_v16 = vpop.f32.mrb[32].mxu1  ;;  %v4906_v17 = vpop.f32.mrb[32].mxu0 }
 0x1c9   : > { %v4908_v18 = vpop.f32.mrb[33].mxu1  ;;  %v4910_v19 = vpop.f32.mrb[33].mxu0 }
 0x1cc   : > { %v4916_v24 = vpop.f32.mrb[34].mxu1  ;;  %v4918_v25 = vpop.f32.mrb[34].mxu0 }
 0x1cd   : > { %v4920_v26 = vpop.f32.mrb[35].mxu1  ;;  %v4922_v27 = vpop.f32.mrb[35].mxu0 }
 0x1d0   : > { %v1493_v28 = vpop.f32.mrb[0].mxu0 }
 0x1d1   : > { %v2027_v32 = vadd.f32 %v4874_v63, %v1493_v28  ;;  %v1495_v33 = vpop.f32.mrb[1].mxu0 }
 0x1d2   : > { %v2028_v21 = vadd.f32 %v4874_v63, %v1495_v33  ;;  %v4947_v33 = vadd.f32 %v4932_v41, %v4862_v56  ;;  %v4964_v56 = vadd.f32 %v4938_v46, %v4866_v59  ;;  %v4983_v59 = vadd.f32 %v4932_v41, %v4886_v6 }
 0x1d3   : > { %v3193_v35 = vmul.f32 -1.442695, %v2027_v32  ;;  %v4998_v6 = vadd.f32 %v4934_v31, %v4898_v13 }
 0x1d4   : > { %v3194_v36 = vmul.f32 -1.442695, %v2028_v21  ;;  %v1499_v37 = vpop.f32.mrb[2].mxu0  ;;  %v4950_v21 = vadd.f32 %v4934_v31, %v964_v8  ;;  %5577 = vst [vmem:[#allocation20_spill] sm:$0xff] %v4983_v59 }
 0x1d5   : > { %3663 = vpow2.f32 %v3193_v35  ;;  %v2034_v38 = vadd.f32 %v4878_v1, %v1499_v37  ;;  %v1501_v30 = vpop.f32.mrb[3].mxu0  ;;  %v4955_v37 = vadd.f32 %v4934_v31, %v4864_v58  ;;  %5580 = vst [vmem:[#allocation23_spill] sm:$0xff] %v4998_v6 }
 0x1d6   : > { %3665 = vpow2.f32 %v3194_v36  ;;  %v2035_v39 = vadd.f32 %v4878_v1, %v1501_v30  ;;  %v4968_v30 = vadd.f32 %v4943_v49, %v4872_v62 }
 0x1d7   : > { %v3200_v22 = vmul.f32 -1.442695, %v2034_v38 }
 0x1d8   : > { %v3201_v40 = vmul.f32 -1.442695, %v2035_v39  ;;  %v1505_v42 = vpop.f32.mrb[4].mxu0  ;;  %v4971_v39 = vadd.f32 %v4932_v41, %v1093_v5  ;;  %v4987_v5 = vadd.f32 %v4932_v41, %v4890_v9 }
 0x1d9   : > { %3667 = vpow2.f32 %v3200_v22  ;;  %v2041_v43 = vadd.f32 %v4876_v0, %v1505_v42  ;;  %v1507_v44 = vpop.f32.mrb[5].mxu0 }
 0x1da   : > { %3669 = vpow2.f32 %v3201_v40  ;;  %v2042_v45 = vadd.f32 %v4876_v0, %v1507_v44  ;;  %v4979_v40 = vadd.f32 %v4932_v41, %v4888_v7  ;;  %5578 = vst [vmem:[#allocation21_spill] sm:$0xff] %v4987_v5 }
 0x1db   : > { %v3207_v47 = vmul.f32 -1.442695, %v2041_v43 }
 0x1dc   : > { %v3208_v28 = vmul.f32 -1.442695, %v2042_v45  ;;  %v1511_v32 = vpop.f32.mrb[6].mxu0 }
 0x1dd   : > { %3671 = vpow2.f32 %v3207_v47  ;;  %v2048_v35 = vadd.f32 %v4880_v2, %v1511_v32  ;;  %v1513_v36 = vpop.f32.mrb[7].mxu0 }
 0x1de   : > { %3673 = vpow2.f32 %v3208_v28  ;;  %v2049_v38 = vadd.f32 %v4880_v2, %v1513_v36  ;;  %v4994_v28 = vadd.f32 %v4934_v31, %v4896_v12  ;;  %v5007_v36 = vadd.f32 %v4934_v31, %v4902_v15 }
 0x1df   : > { %v3664_v8 = vpop.eup %3663  ;;  %v3214_v58 = vmul.f32 -1.442695, %v2048_v35  ;;  %v5003_v35 = vadd.f32 %v4934_v31, %v4900_v14  ;;  %v5017_v14 = vadd.f32 %v4938_v46, %v4906_v17 }
 0x1e0   : > { %v3666_v22 = vpop.eup %3665  ;;  %v2139_v42 = vadd.f32 1.0, %v3664_v8  ;;  %v3215_v62 = vmul.f32 -1.442695, %v2049_v38  ;;  %v3314_v43 = vpop.f32.mrb[44].mxu1  ;;  %5581 = vst [vmem:[#allocation24_spill] sm:$0xff] %v5007_v36  ;;  %v5011_v8 = vadd.f32 %v4938_v46, %v4904_v16  ;;  %v5024_v16 = vadd.f32 %v4938_v46, %v4908_v18 }
 0x1e1   : > { %v1517_v44 = vpop.f32.mrb[8].mxu0  ;;  %v2140_v45 = vadd.f32 1.0, %v3666_v22  ;;  %3675 = vpow2.f32 %v3214_v58  ;;  %v4990_v47 = vpop.f32.mrb[45].mxu1  ;;  %5583 = vst [vmem:[#allocation26_spill] sm:$0xff] %v5017_v14 }
 0x1e2   : > { %v2271_v61 = vadd.f32 %v4882_v3, %v1517_v44  ;;  %5579 = vst [vmem:[#allocation22_spill] sm:$0xff] %v4990_v47  ;;  %v1519_v7 = vpop.f32.mrb[9].mxu0  ;;  %3677 = vrcp.f32 %v2139_v42  ;;  %5585 = vst [vmem:[#allocation28_spill] sm:$0xff] %v5024_v16 }
 0x1e3   : > { %v2272_v32 = vadd.f32 %v4882_v3, %v1519_v7  ;;  %v3668_v9 = vpop.eup %3667  ;;  %3679 = vrcp.f32 %v2140_v45 }
 0x1e4   : > { %v3221_v38 = vmul.f32 -1.442695, %v2271_v61  ;;  %v3670_v12 = vpop.eup %3669  ;;  %v2146_v13 = vadd.f32 1.0, %v3668_v9  ;;  %3681 = vpow2.f32 %v3215_v62  ;;  %v5013_v22 = vpop.f32.mrb[46].mxu1  ;;  %v5028_v62 = vadd.f32 %v4938_v46, %v4910_v19 }
 0x1e5   : > { %v3222_v58 = vmul.f32 -1.442695, %v2272_v32  ;;  %5582 = vst [vmem:[#allocation25_spill] sm:$0xff] %v5013_v22  ;;  %v1523_v42 = vpop.f32.mrb[10].mxu0  ;;  %v2147_v44 = vadd.f32 1.0, %v3670_v12  ;;  %v5020_v45 = vpop.f32.mrb[47].mxu1  ;;  %v5033_v32 = vadd.f32 %v4943_v49, %v4916_v24  ;;  %v5037_v9 = vadd.f32 %v4943_v49, %v4918_v25 }
 0x1e6   : > { %3683 = vpow2.f32 %v3221_v38  ;;  %v2278_v15 = vadd.f32 %v4884_v4, %v1523_v42  ;;  %5584 = vst [vmem:[#allocation27_spill] sm:$0xff] %v5020_v45  ;;  %v1525_v61 = vpop.f32.mrb[11].mxu0  ;;  %5586 = vst [vmem:[#allocation29_spill] sm:$0xff] %v5028_v62  ;;  %v5041_v12 = vadd.f32 %v4943_v49, %v4920_v26 }
 0x1e7   : > { %3685 = vrcp.f32 %v2146_v13  ;;  %v2279_v7 = vadd.f32 %v4884_v4, %v1525_v61  ;;  %v3672_v17 = vpop.eup %3671  ;;  %5587 = vst [vmem:[#allocation30_spill] sm:$0xff] %v5033_v32  ;;  %5588 = vst [vmem:[#allocation31_spill] sm:$0xff] %v5037_v9  ;;  %v3892_v32 = vld [vmem:[%s4388_s16 + $0xb0] sm:$0xff] }
 0x1e8   : > { %3687 = vrcp.f32 %v2147_v44  ;;  %v3228_v38 = vmul.f32 -1.442695, %v2278_v15  ;;  %v3674_v18 = vpop.eup %3673  ;;  %5589 = vst [vmem:[#allocation32_spill] sm:$0xff] %v5041_v12  ;;  %v2153_v19 = vadd.f32 1.0, %v3672_v17  ;;  %v1529_v42 = vpop.f32.mrb[36].mxu0  ;;  %v5047_v44 = vadd.f32 %v4943_v49, %v4922_v27 }
 0x1e9   : > { %3689 = vpow2.f32 %v3222_v58  ;;  %v3229_v13 = vmul.f32 -1.442695, %v2279_v7  ;;  %v1630_v61 = vpop.f32.mrb[12].mxu1  ;;  %v2154_v46 = vadd.f32 1.0, %v3674_v18  ;;  %v2237_v24 = vadd.f32 %v1529_v42, %v4854_v50  ;;  %v1531_v25 = vpop.f32.mrb[37].mxu0 }
 0x1ea   : > { %3691 = vpow2.f32 %v3228_v38  ;;  %v2029_v45 = vadd.f32 %v4874_v63, %v1630_v61  ;;  %v1632_v9 = vpop.f32.mrb[13].mxu1  ;;  %5590 = vst [vmem:[#allocation33_spill] sm:$0xff] %v5047_v44  ;;  %v2238_v26 = vadd.f32 %v1531_v25, %v4856_v51  ;;  %v5052_v7 = vadd.f32 %v3314_v43, %v4934_v31 }
 0x1eb   : > { %3693 = vrcp.f32 %v2153_v19  ;;  %v2030_v58 = vadd.f32 %v4874_v63, %v1632_v9  ;;  %v3676_v15 = vpop.eup %3675  ;;  %v2285_v50 = vadd.f32 %v4892_v10, %v2237_v24 }
 0x1ec   : > { %3695 = vrcp.f32 %v2154_v46  ;;  %5591 = vst [vmem:[#allocation34_spill] sm:$0xff] %v5052_v7  ;;  %v3195_v17 = vmul.f32 -1.442695, %v2029_v45  ;;  %v3678_v38 = vpop.eup %3677  ;;  %v2160_v18 = vadd.f32 1.0, %v3676_v15  ;;  %v2286_v42 = vadd.f32 %v4892_v10, %v2238_v26  ;;  %v1535_v61 = vpop.f32.mrb[38].mxu0 }
 0x1ed   : > { %3697 = vpow2.f32 %v3229_v13  ;;  %v3196_v27 = vmul.f32 -1.442695, %v2030_v58  ;;  %v1636_v19 = vpop.f32.mrb[14].mxu1  ;;  %v3680_v44 = vpop.eup %3679  ;;  %v3235_v51 = vmul.f32 -1.442695, %v2285_v50  ;;  %v2244_v9 = vadd.f32 %v1535_v61, %v4858_v52 }
 0x1ee   : > { %3699 = vpow2.f32 %v3195_v17  ;;  %v2036_v46 = vadd.f32 %v4878_v1, %v1636_v19  ;;  %v1537_v31 = vpop.f32.mrb[39].mxu0  ;;  %v1638_v43 = vpop.f32.mrb[15].mxu1  ;;  %v3236_v45 = vmul.f32 -1.442695, %v2286_v42 }
 0x1ef   : > { %v3682_v25 = vpop.eup %3681  ;;  %3701 = vrcp.f32 %v2160_v18  ;;  %v2245_v24 = vadd.f32 %v1537_v31, %v4860_v53  ;;  %v2037_v13 = vadd.f32 %v4878_v1, %v1638_v43  ;;  %v2292_v15 = vadd.f32 %v4894_v11, %v2244_v9 }
 0x1f0   : > { %v3684_v26 = vpop.eup %3683  ;;  %v2161_v58 = vadd.f32 1.0, %v3682_v25  ;;  %3703 = vpow2.f32 %v3235_v51  ;;  %v3202_v50 = vmul.f32 -1.442695, %v2036_v46  ;;  %v1541_v19 = vpop.f32.mrb[40].mxu0 }
 0x1f1   : > { %v3686_v17 = vpop.eup %3685  ;;  %v2383_v62 = vadd.f32 1.0, %v3684_v26  ;;  %3705 = vpow2.f32 %v3236_v45  ;;  %v2293_v52 = vadd.f32 %v4894_v11, %v2245_v24  ;;  %v5062_v61 = vmul.f32 -1.442695, %v2037_v13  ;;  %v1642_v18 = vpop.f32.mrb[16].mxu1 }
 0x1f2   : > { %v3688_v42 = vpop.eup %3687  ;;  %3707 = vrcp.f32 %v2161_v58  ;;  %v3242_v53 = vmul.f32 -1.442695, %v2292_v15  ;;  %v2535_v31 = vadd.f32 %v4912_v20, %v1541_v19  ;;  %v2043_v43 = vadd.f32 %v4876_v0, %v1642_v18  ;;  %v1543_v51 = vpop.f32.mrb[41].mxu0 }
 0x1f3   : > { %v1644_v25 = vpop.f32.mrb[17].mxu1  ;;  %v3690_v9 = vpop.eup %3689  ;;  %3709 = vrcp.f32 %v2383_v62  ;;  %v3243_v46 = vmul.f32 -1.442695, %v2293_v52  ;;  %v2536_v45 = vadd.f32 %v4912_v20, %v1543_v51 }
 0x1f4   : > { %v2044_v24 = vadd.f32 %v4876_v0, %v1644_v25  ;;  %v3692_v13 = vpop.eup %3691  ;;  %v2384_v26 = vadd.f32 1.0, %v3690_v9  ;;  %3711 = vpow2.f32 %v3196_v27  ;;  %v2563_v7 = vmul.f32 %v3678_v38, %v2535_v31  ;;  %v1547_v22 = vpop.f32.mrb[42].mxu0 }
 0x1f5   : > { %v5068_v14 = vmul.f32 -1.442695, %v2043_v43  ;;  %v5070_v58 = vpop.eup %3693  ;;  %v2390_v15 = vadd.f32 1.0, %v3692_v13  ;;  %3713 = vpow2.f32 %v3242_v53  ;;  %v2564_v19 = vmul.f32 %v3680_v44, %v2536_v45  ;;  %v1648_v62 = vpop.f32.mrb[18].mxu1 }
 0x1f6   : > { %v5072_v18 = vmul.f32 -1.442695, %v2044_v24  ;;  %v5074_v52 = vpop.eup %3695  ;;  %3715 = vrcp.f32 %v2384_v26  ;;  %v2591_v51 = vadd.f32 %v2563_v7, %v4947_v33  ;;  %v2542_v25 = vadd.f32 %v4914_v23, %v1547_v22  ;;  %v1549_v27 = vpop.f32.mrb[43].mxu0 }
 0x1f7   : > { %v2050_v38 = vadd.f32 %v4880_v2, %v1648_v62  ;;  %v1650_v31 = vpop.f32.mrb[19].mxu1  ;;  %v3698_v43 = vpop.eup %3697  ;;  %3717 = vrcp.f32 %v2390_v15  ;;  %v2592_v53 = vadd.f32 %v2564_v19, %v4941_v48  ;;  %v2543_v44 = vadd.f32 %v4914_v23, %v1549_v27 }
 0x1f8   : > { %v2051_v9 = vadd.f32 %v4880_v2, %v1650_v31  ;;  %v3700_v45 = vpop.eup %3699  ;;  %v2391_v24 = vadd.f32 1.0, %v3698_v43  ;;  %3719 = vpow2.f32 %v3202_v50  ;;  %vm2619_vm2 = vcmp.ge.f32.partialorder %v2591_v51, 0.0  ;;  %v1553_v26 = vpop.f32.mrb[44].mxu0 }
 0x1f9   : > { %v2647_v13 = vmul.f32 0.2, %v2591_v51  ;;  %v5082_v33 = vpop.eup %3701  ;;  %v2141_v22 = vadd.f32 1.0, %v3700_v45  ;;  %3721 = vpow2.f32 %v3243_v46  ;;  %vm2620_vm3 = vcmp.ge.f32.partialorder %v2592_v53, 0.0  ;;  %v1654_v62 = vpop.f32.mrb[20].mxu1 }
 0x1fa   : > { %v2648_v7 = vmul.f32 0.2, %v2592_v53  ;;  %v3704_v15 = vpop.eup %3703  ;;  %3723 = vrcp.f32 %v2391_v24  ;;  %v2570_v19 = vmul.f32 %v3686_v17, %v2542_v25  ;;  %v3216_v27 = vmul.f32 -1.442695, %v2050_v38  ;;  %v5084_v49 = vpop.f32.mrb[45].mxu0 }
 0x1fb   : > { %v2675_v48 = vsel %vm2619_vm2, %v2591_v51, %v2647_v13  ;;  %v5086_v31 = vpop.f32.mrb[21].mxu1  ;;  %v3706_v50 = vpop.eup %3705  ;;  %v2397_v43 = vadd.f32 1.0, %v3704_v15  ;;  %3725 = vrcp.f32 %v2141_v22  ;;  %v2571_v6 = vmul.f32 %v3688_v42, %v2543_v44 }
 0x1fc   : > { %v2676_v36 = vsel %vm2620_vm3, %v2592_v53, %v2648_v7  ;;  %v5088_v45 = vpop.eup %3707  ;;  %v2398_v46 = vadd.f32 1.0, %v3706_v50  ;;  %3727 = vpow2.f32 %v5062_v61  ;;  %v2598_v5 = vadd.f32 %v2570_v19, %v4955_v37  ;;  %v5095_v13 = vpop.f32.mrb[46].mxu0  ;;  %v3887_v50 = vld [vmem:[%s4388_s16 + $0x8] sm:$0xff] }
 0x1fd   : > { %v3217_v24 = vmul.f32 -1.442695, %v2051_v9  ;;  %v3710_v51 = vpop.eup %3709  ;;  %3729 = vrcp.f32 %v2397_v43  ;;  %v2599_v17 = vadd.f32 %v2571_v6, %v4950_v21  ;;  %v2549_v25 = vadd.f32 %v4924_v29, %v1553_v26  ;;  %v5097_v53 = vpop.f32.mrb[22].mxu1 }
 0x1fe   : > { %v2273_v38 = vadd.f32 %v4882_v3, %v1654_v62  ;;  %v3712_v42 = vpop.eup %3711  ;;  %3731 = vrcp.f32 %v2398_v46  ;;  %v2703_v44 = vsub.f32 1.0, %v3710_v51  ;;  %v2759_v61 = vmul.f32 %v3710_v51, %v4530_v54  ;;  %v5100_v37 = vpop.f32.mrb[47].mxu0 }
 0x1ff   : > { %vm2626_vm4 = vcmp.ge.f32.partialorder %v2598_v5, 0.0  ;;  %v5102_v9 = vpop.f32.mrb[23].mxu1  ;;  %v3714_v21 = vpop.eup %3713  ;;  %v2142_v6 = vadd.f32 1.0, %v3712_v42  ;;  %3733 = vpow2.f32 %v5068_v14  ;;  %v2654_v22 = vmul.f32 0.2, %v2598_v5 }
 0x200   : > { %vm2627_vm5 = vcmp.ge.f32.partialorder %v2599_v17, 0.0  ;;  %v3716_v7 = vpop.eup %3715  ;;  %v2404_v26 = vadd.f32 1.0, %v3714_v21  ;;  %v2731_v62 = vmul.f32 %v2703_v44, %v2675_v48  ;;  %3735 = vpow2.f32 %v5072_v18  ;;  %v5108_v51 = vpop.f32.mrb[24].mxu1 }
 0x201   : > { %v2655_v15 = vmul.f32 0.2, %v2599_v17  ;;  %v3718_v19 = vpop.eup %3717  ;;  %3737 = vrcp.f32 %v2142_v6  ;;  %v2704_v54 = vsub.f32 1.0, %v3716_v7  ;;  %v2760_v43 = vmul.f32 %v3887_v50, %v3716_v7  ;;  %v5110_v42 = vpop.f32.mrb[12].mxu0 }
 0x202   : > { %v2682_v46 = vsel %vm2626_vm4, %v2598_v5, %v2654_v22  ;;  %v3720_v14 = vpop.eup %3719  ;;  %3739 = vrcp.f32 %v2404_v26  ;;  %v2787_v41 = vadd.f32 %v2759_v61, %v2731_v62  ;;  %v2710_v21 = vsub.f32 1.0, %v3718_v19  ;;  %v5113_v18 = vpop.f32.mrb[25].mxu1 }
 0x203   : > { %v2766_v48 = vmul.f32 %v3718_v19, %v4533_v55  ;;  %v5115_v44 = vpop.f32.mrb[13].mxu0  ;;  %v3722_v6 = vpop.eup %3721  ;;  %v2148_v7 = vadd.f32 1.0, %v3720_v14  ;;  %v2732_v50 = vmul.f32 %v2704_v54, %v2676_v36  ;;  %3741 = vpow2.f32 %v3216_v27  ;;  %v3888_v27 = vld [vmem:[%s4388_s16 + $0x40] sm:$0xff] }
 0x204   : > { %v2683_v5 = vsel %vm2627_vm5, %v2599_v17, %v2655_v15  ;;  %v3724_v22 = vpop.eup %3723  ;;  %v2405_v47 = vadd.f32 1.0, %v3722_v6  ;;  %2815 = vst [vmem:[%s5120_s19] sm:$0xff] %v2787_v41  ;;  %v2738_v61 = vmul.f32 %v2710_v21, %v2682_v46  ;;  %3743 = vpow2.f32 %v3217_v24  ;;  %v5127_v17 = vpop.f32.mrb[26].mxu1 }
 0x205   : > { %v2577_v55 = vmul.f32 %v5070_v58, %v2549_v25  ;;  %v5124_v26 = vpop.eup %3725  ;;  %3745 = vrcp.f32 %v2148_v7  ;;  %v2788_v62 = vadd.f32 %v2760_v43, %v2732_v50  ;;  %v2711_v36 = vsub.f32 1.0, %v3724_v22  ;;  %v5129_v15 = vpop.f32.mrb[14].mxu0 }
 0x206   : > { %v2767_v19 = vmul.f32 %v3888_v27, %v3724_v22  ;;  %v3728_v54 = vpop.eup %3727  ;;  %3747 = vrcp.f32 %v2405_v47  ;;  %v2794_v41 = vadd.f32 %v2766_v48, %v2738_v61  ;;  %v3223_v58 = vmul.f32 -1.442695, %v2273_v38  ;;  %v5132_v25 = vpop.f32.mrb[27].mxu1  ;;  %v3889_v48 = vld [vmem:[%s4388_s16 + $0x70] sm:$0xff] }
 0x207   : > { %v2605_v24 = vadd.f32 %v2577_v55, %v4964_v56  ;;  %v5134_v46 = vpop.f32.mrb[15].mxu0  ;;  %v3730_v43 = vpop.eup %3729  ;;  %v2149_v14 = vadd.f32 1.0, %v3728_v54  ;;  %2816 = vst [vmem:[%s5120_s19 + $0x8] sm:$0xff] %v2788_v62  ;;  %v2739_v21 = vmul.f32 %v2711_v36, %v2683_v5  ;;  %v2550_v6 = vadd.f32 %v4924_v29, %v5084_v49  ;;  %v3890_v54 = vld [vmem:[%s4388_s16 + $0x78] sm:$0xff] }
 0x208   : > { %v2274_v7 = vadd.f32 %v4882_v3, %v5086_v31  ;;  %v3732_v47 = vpop.eup %3731  ;;  %2822 = vst [vmem:[%s5120_s19 + $0x38] sm:$0xff] %v2794_v41  ;;  %v2717_v38 = vsub.f32 1.0, %v3730_v43  ;;  %v2773_v50 = vmul.f32 %v3889_v48, %v3730_v43  ;;  %v5144_v62 = vpop.f32.mrb[48].mxu1 }
 0x209   : > { %vm2633_vm6 = vcmp.ge.f32.partialorder %v2605_v24, 0.0  ;;  %v2661_v56 = vmul.f32 0.2, %v2605_v24  ;;  %v3734_v22 = vpop.eup %3733  ;;  %3749 = vrcp.f32 %v2149_v14  ;;  %v2795_v61 = vadd.f32 %v2767_v19, %v2739_v21  ;;  %v5146_v49 = vpop.f32.mrb[16].mxu0 }
 0x20a   : > { %v2578_v5 = vmul.f32 %v5074_v52, %v2550_v6  ;;  %v2718_v55 = vsub.f32 1.0, %v3732_v47  ;;  %v3736_v31 = vpop.eup %3735  ;;  %v2155_v36 = vadd.f32 1.0, %v3734_v22  ;;  %3751 = vpow2.f32 %v3223_v58  ;;  %v5149_v59 = vpop.f32.mrb[49].mxu1 }
 0x20b   : > { %v2689_v27 = vsel %vm2633_vm6, %v2605_v24, %v2661_v56  ;;  %v2774_v41 = vmul.f32 %v3890_v54, %v3732_v47  ;;  %v5151_v43 = vpop.f32.mrb[17].mxu0  ;;  %v5153_v14 = vpop.eup %3737  ;;  %v2156_v19 = vadd.f32 1.0, %v3736_v31  ;;  %2823 = vst [vmem:[%s5120_s19 + $0x40] sm:$0xff] %v2795_v61  ;;  %v3224_v6 = vmul.f32 -1.442695, %v2274_v7  ;;  %v3891_v54 = vld [vmem:[%s4388_s16 + $0xa8] sm:$0xff] }
 0x20c   : > { %v2745_v52 = vmul.f32 %v2717_v38, %v2689_v27  ;;  %v2606_v21 = vadd.f32 %v2578_v5, %v4959_v57  ;;  %v3740_v48 = vpop.eup %3739  ;;  %3753 = vrcp.f32 %v2155_v36  ;;  %v2556_v24 = vadd.f32 %v4927_v34, %v5095_v13  ;;  %v5163_v57 = vpop.f32.mrb[50].mxu1 }
 0x20d   : > { %v2280_v58 = vadd.f32 %v4884_v4, %v5097_v53  ;;  %v2557_v47 = vadd.f32 %v4927_v34, %v5100_v37  ;;  %v3742_v56 = vpop.eup %3741  ;;  %3755 = vrcp.f32 %v2156_v19  ;;  %v5165_v7 = vpop.f32.mrb[18].mxu0  ;;  %v2724_v53 = vsub.f32 1.0, %v3740_v48 }
 0x20e   : > { %v2801_v22 = vadd.f32 %v2773_v50, %v2745_v52  ;;  %vm2634_vm7 = vcmp.ge.f32.partialorder %v2606_v21, 0.0  ;;  %v2662_v38 = vmul.f32 0.2, %v2606_v21  ;;  %v3744_v61 = vpop.eup %3743  ;;  %v2162_v5 = vadd.f32 1.0, %v3742_v56  ;;  %v5168_v31 = vpop.f32.mrb[51].mxu1 }
 0x20f   : > { %3757 = vpow2.f32 %v3224_v6  ;;  %v2584_v13 = vmul.f32 %v5082_v33, %v2556_v24  ;;  %v5170_v37 = vpop.f32.mrb[19].mxu0  ;;  %v5172_v36 = vpop.eup %3745  ;;  %v2163_v50 = vadd.f32 1.0, %v3744_v61  ;;  %v2780_v19 = vmul.f32 %v3891_v54, %v3740_v48 }
 0x210   : > { %2829 = vst [vmem:[%s5120_s19 + $0x70] sm:$0xff] %v2801_v22  ;;  %v2690_v27 = vsel %vm2634_vm7, %v2606_v21, %v2662_v38  ;;  %v3230_v52 = vmul.f32 -1.442695, %v2280_v58  ;;  %v3748_v12 = vpop.eup %3747  ;;  %3759 = vrcp.f32 %v2162_v5  ;;  %v2585_v33 = vmul.f32 %v5088_v45, %v2557_v47  ;;  %v5181_v22 = vpop.f32.mrb[52].mxu1 }
 0x211   : > { %v2746_v56 = vmul.f32 %v2718_v55, %v2690_v27  ;;  %v2612_v6 = vadd.f32 %v2584_v13, %v4975_v60  ;;  %3761 = vrcp.f32 %v2163_v50  ;;  %v2725_v24 = vsub.f32 1.0, %v3748_v12  ;;  %v5183_v21 = vpop.f32.mrb[20].mxu0  ;;  %v5185_v55 = vpop.f32.mrb[53].mxu1 }
 0x212   : > { %v2781_v16 = vmul.f32 %v3892_v32, %v3748_v12  ;;  %v2281_v61 = vadd.f32 %v4884_v4, %v5102_v9  ;;  %3763 = vpow2.f32 %v3230_v52  ;;  %v5187_v60 = vpop.f32.mrb[21].mxu0  ;;  %v2613_v32 = vadd.f32 %v2585_v33, %v4968_v30 }
 0x213   : > { %v2802_v48 = vadd.f32 %v2774_v41, %v2746_v56  ;;  %vm2640_vm8 = vcmp.ge.f32.partialorder %v2612_v6, 0.0  ;;  %v2668_v58 = vmul.f32 0.2, %v2612_v6  ;;  %v5189_v45 = vpop.eup %3749  ;;  %v2287_v9 = vadd.f32 %v4892_v10, %v5108_v51 }
 0x214   : > { %v3231_v12 = vmul.f32 -1.442695, %v2281_v61  ;;  %v2031_v47 = vadd.f32 %v4874_v63, %v5110_v42  ;;  %v3752_v38 = vpop.eup %3751  ;;  %v2288_v5 = vadd.f32 %v4892_v10, %v5113_v18  ;;  %v2032_v13 = vadd.f32 %v4874_v63, %v5115_v44  ;;  %v5203_v51 = vpop.f32.mrb[54].mxu1 }
 0x215   : > { %2830 = vst [vmem:[%s5120_s19 + $0x78] sm:$0xff] %v2802_v48  ;;  %v2696_v41 = vsel %vm2640_vm8, %v2612_v6, %v2668_v58  ;;  %v2294_v50 = vadd.f32 %v4894_v11, %v5127_v17  ;;  %v2385_v30 = vadd.f32 1.0, %v3752_v38  ;;  %vm2641_vm9 = vcmp.ge.f32.partialorder %v2613_v32, 0.0  ;;  %v5205_v52 = vpop.f32.mrb[22].mxu0 }
 0x216   : > { %v2752_v27 = vmul.f32 %v2724_v53, %v2696_v41  ;;  %v2669_v54 = vmul.f32 0.2, %v2613_v32  ;;  %v5207_v42 = vpop.eup %3753  ;;  %3765 = vpow2.f32 %v3231_v12  ;;  %v3237_v56 = vmul.f32 -1.442695, %v2287_v9  ;;  %v5211_v53 = vpop.f32.mrb[55].mxu1 }
 0x217   : > { %v3197_v18 = vmul.f32 -1.442695, %v2031_v47  ;;  %v3238_v6 = vmul.f32 -1.442695, %v2288_v5  ;;  %v5209_v33 = vpop.eup %3755  ;;  %3767 = vrcp.f32 %v2385_v30  ;;  %v3198_v61 = vmul.f32 -1.442695, %v2032_v13 }
 0x218   : > { %v2808_v44 = vadd.f32 %v2780_v19, %v2752_v27  ;;  %v2697_v17 = vsel %vm2641_vm9, %v2613_v32, %v2669_v54  ;;  %v5213_v48 = vpop.f32.mrb[23].mxu0  ;;  %3769 = vpow2.f32 %v3237_v56  ;;  %v3244_v41 = vmul.f32 -1.442695, %v2294_v50  ;;  %v5224_v5 = vpop.f32.mrb[36].mxu1 }
 0x219   : > { %v3758_v58 = vpop.eup %3757  ;;  %v2753_v38 = vmul.f32 %v2725_v24, %v2697_v17  ;;  %v2038_v12 = vadd.f32 %v4878_v1, %v5129_v15  ;;  %3771 = vpow2.f32 %v3197_v18  ;;  %v2295_v47 = vadd.f32 %v4894_v11, %v5132_v25  ;;  %v5222_v32 = vpop.f32.mrb[24].mxu0 }
 0x21a   : > { %v2386_v9 = vadd.f32 1.0, %v3758_v58  ;;  %2836 = vst [vmem:[%s5120_s19 + $0xa8] sm:$0xff] %v2808_v44  ;;  %v2039_v19 = vadd.f32 %v4878_v1, %v5134_v46  ;;  %v5226_v24 = vpop.eup %3759  ;;  %3773 = vpow2.f32 %v3238_v6  ;;  %v2537_v15 = vadd.f32 %v4912_v20, %v5144_v62  ;;  %v5230_v30 = vpop.f32.mrb[25].mxu0 }
 0x21b   : > { %v2809_v13 = vadd.f32 %v2781_v16, %v2753_v38  ;;  %v3204_v50 = vmul.f32 -1.442695, %v2038_v12  ;;  %v5232_v27 = vpop.f32.mrb[37].mxu1  ;;  %v5234_v25 = vpop.eup %3761  ;;  %v3245_v46 = vmul.f32 -1.442695, %v2295_v47  ;;  %v2045_v56 = vadd.f32 %v4876_v0, %v5146_v49 }
 0x21c   : > { %3775 = vrcp.f32 %v2386_v9  ;;  %v3205_v54 = vmul.f32 -1.442695, %v2039_v19  ;;  %v3764_v18 = vpop.eup %3763  ;;  %v2565_v16 = vmul.f32 %v5124_v26, %v2537_v15  ;;  %v2538_v62 = vadd.f32 %v4912_v20, %v5149_v59  ;;  %v5246_v38 = vpop.f32.mrb[26].mxu0 }
 0x21d   : > { %2837 = vst [vmem:[%s5120_s19 + $0xb0] sm:$0xff] %v2809_v13  ;;  %3777 = vpow2.f32 %v3198_v61  ;;  %v2046_v6 = vadd.f32 %v4876_v0, %v5151_v43  ;;  %v2392_v44 = vadd.f32 1.0, %v3764_v18  ;;  %v3211_v17 = vmul.f32 -1.442695, %v2045_v56  ;;  %v5248_v49 = vpop.f32.mrb[38].mxu1  ;;  %v5252_v59 = vpop.f32.mrb[27].mxu0 }
 0x21e   : > { %3779 = vpow2.f32 %v3244_v41  ;;  %v2544_v58 = vadd.f32 %v4914_v23, %v5163_v57  ;;  %v2593_v61 = vadd.f32 %v2565_v16, %v4971_v39  ;;  %v2566_v26 = vmul.f32 %v5153_v14, %v2538_v62  ;;  %v5254_v9 = vpop.f32.mrb[39].mxu1  ;;  %v3893_v16 = vld [vmem:[%s4388_s16 + $0x10] sm:$0xff] }
 0x21f   : > { %3781 = vpow2.f32 %v3204_v50  ;;  %v3212_v12 = vmul.f32 -1.442695, %v2046_v6  ;;  %v2052_v57 = vadd.f32 %v4880_v2, %v5165_v7  ;;  %v2545_v41 = vadd.f32 %v4914_v23, %v5168_v31 }
 0x220   : > { %3783 = vrcp.f32 %v2392_v44  ;;  %v2572_v43 = vmul.f32 %v5172_v36, %v2544_v58  ;;  %v3766_v47 = vpop.eup %3765  ;;  %vm2621_vm10 = vcmp.ge.f32.partialorder %v2593_v61, 0.0  ;;  %v2649_v39 = vmul.f32 0.2, %v2593_v61  ;;  %v5263_v36 = vpop.f32.mrb[48].mxu0 }
 0x221   : > { %3785 = vpow2.f32 %v3245_v46  ;;  %v2594_v14 = vadd.f32 %v2566_v26, %v4979_v40  ;;  %v3768_v19 = vpop.eup %3767  ;;  %v2393_v13 = vadd.f32 1.0, %v3766_v47  ;;  %v3218_v15 = vmul.f32 -1.442695, %v2052_v57  ;;  %v5265_v56 = vpop.f32.mrb[40].mxu1 }
 0x222   : > { %3787 = vpow2.f32 %v3205_v54  ;;  %v2600_v50 = vadd.f32 %v2572_v43, %v4994_v28  ;;  %v3770_v7 = vpop.eup %3769  ;;  %v2677_v18 = vsel %vm2621_vm10, %v2593_v61, %v2649_v39  ;;  %v2705_v31 = vsub.f32 1.0, %v3768_v19  ;;  %v5268_v46 = vpop.f32.mrb[49].mxu0 }
 0x223   : > { %v2761_v62 = vmul.f32 %v3893_v16, %v3768_v19  ;;  %3789 = vpow2.f32 %v3211_v17  ;;  %v5270_v6 = vpop.f32.mrb[41].mxu1  ;;  %v3772_v40 = vpop.eup %3771  ;;  %v2399_v54 = vadd.f32 1.0, %v3770_v7  ;;  %vm2622_vm11 = vcmp.ge.f32.partialorder %v2594_v14, 0.0  ;;  %v3894_v16 = vld [vmem:[%s4388_s16 + $0x18] sm:$0xff] }
 0x224   : > { %3791 = vrcp.f32 %v2393_v13  ;;  %v2650_v28 = vmul.f32 0.2, %v2594_v14  ;;  %v3774_v44 = vpop.eup %3773  ;;  %v2143_v58 = vadd.f32 1.0, %v3772_v40  ;;  %v2733_v26 = vmul.f32 %v2705_v31, %v2677_v18  ;;  %v5272_v47 = vpop.f32.mrb[50].mxu0 }
 0x225   : > { %3793 = vpow2.f32 %v3212_v12  ;;  %vm2628_vm12 = vcmp.ge.f32.partialorder %v2600_v50, 0.0  ;;  %v2400_v43 = vadd.f32 1.0, %v3774_v44  ;;  %v2656_v17 = vmul.f32 0.2, %v2600_v50  ;;  %v5274_v39 = vpop.f32.mrb[42].mxu1  ;;  %v5277_v40 = vpop.f32.mrb[51].mxu0 }
 0x226   : > { %v3776_v61 = vpop.eup %3775  ;;  %3795 = vrcp.f32 %v2399_v54  ;;  %v2678_v57 = vsel %vm2622_vm11, %v2594_v14, %v2650_v28  ;;  %v2789_v13 = vadd.f32 %v2761_v62, %v2733_v26  ;;  %v5279_v12 = vpop.f32.mrb[43].mxu1  ;;  %v2573_v54 = vmul.f32 %v5189_v45, %v2545_v41 }
 0x227   : > { %v3778_v19 = vpop.eup %3777  ;;  %3797 = vrcp.f32 %v2143_v58  ;;  %v2706_v7 = vsub.f32 1.0, %v3776_v61  ;;  %v2762_v23 = vmul.f32 %v3894_v16, %v3776_v61  ;;  %v2684_v14 = vsel %vm2628_vm12, %v2600_v50, %v2656_v17  ;;  %v3895_v17 = vld [vmem:[%s4388_s16 + $0x48] sm:$0xff] }
 0x228   : > { %v3780_v18 = vpop.eup %3779  ;;  %3799 = vrcp.f32 %v2400_v43  ;;  %v2144_v31 = vadd.f32 1.0, %v3778_v19  ;;  %2817 = vst [vmem:[%s5120_s19 + $0x10] sm:$0xff] %v2789_v13  ;;  %v2053_v62 = vadd.f32 %v4880_v2, %v5170_v37  ;;  %v2601_v16 = vadd.f32 %v2573_v54, %v5003_v35  ;;  %v5289_v50 = vpop.f32.mrb[52].mxu0 }
 0x229   : > { %v3782_v28 = vpop.eup %3781  ;;  %v2406_v44 = vadd.f32 1.0, %v3780_v18  ;;  %v2734_v58 = vmul.f32 %v2706_v7, %v2678_v57  ;;  %3801 = vpow2.f32 %v3218_v15  ;;  %v2551_v43 = vadd.f32 %v4924_v29, %v5181_v22  ;;  %v5291_v45 = vpop.f32.mrb[56].mxu1 }
 0x22a   : > { %v3784_v26 = vpop.eup %3783  ;;  %3803 = vrcp.f32 %v2144_v31  ;;  %v2150_v61 = vadd.f32 1.0, %v3782_v28  ;;  %v5294_v37 = vpop.f32.mrb[53].mxu0  ;;  %vm2629_vm13 = vcmp.ge.f32.partialorder %v2601_v16, 0.0  ;;  %v2657_v22 = vmul.f32 0.2, %v2601_v16 }
 0x22b   : > { %v3786_v41 = vpop.eup %3785  ;;  %3805 = vrcp.f32 %v2406_v44  ;;  %v2790_v57 = vadd.f32 %v2762_v23, %v2734_v58  ;;  %v2712_v15 = vsub.f32 1.0, %v3784_v26  ;;  %v2768_v19 = vmul.f32 %v3895_v17, %v3784_v26  ;;  %v5296_v13 = vpop.f32.mrb[57].mxu1 }
 0x22c   : > { %5592 = vst [vmem:[#allocation35_spill] sm:$0xff] %v5296_v13  ;;  %v3788_v7 = vpop.eup %3787  ;;  %3807 = vrcp.f32 %v2150_v61  ;;  %v2407_v35 = vadd.f32 1.0, %v3786_v41  ;;  %v3219_v28 = vmul.f32 -1.442695, %v2053_v62  ;;  %v2579_v23 = vmul.f32 %v5207_v42, %v2551_v43  ;;  %v5302_v13 = vpop.f32.mrb[54].mxu0  ;;  %v3896_v62 = vld [vmem:[%s4388_s16 + $0x50] sm:$0xff] }
 0x22d   : > { %v3790_v18 = vpop.eup %3789  ;;  %v2151_v31 = vadd.f32 1.0, %v3788_v7  ;;  %2818 = vst [vmem:[%s5120_s19 + $0x18] sm:$0xff] %v2790_v57  ;;  %v2740_v54 = vmul.f32 %v2712_v15, %v2684_v14  ;;  %v2685_v26 = vsel %vm2629_vm13, %v2601_v16, %v2657_v22  ;;  %v2275_v17 = vadd.f32 %v4882_v3, %v5183_v21  ;;  %v5304_v61 = vpop.f32.mrb[58].mxu1 }
 0x22e   : > { %v3792_v44 = vpop.eup %3791  ;;  %3809 = vrcp.f32 %v2407_v35  ;;  %v2157_v58 = vadd.f32 1.0, %v3790_v18  ;;  %v5307_v42 = vpop.f32.mrb[55].mxu0  ;;  %v2607_v21 = vadd.f32 %v2579_v23, %v5011_v8 }
 0x22f   : > { %v3794_v41 = vpop.eup %3793  ;;  %3811 = vrcp.f32 %v2151_v31  ;;  %v2796_v7 = vadd.f32 %v2768_v19, %v2740_v54  ;;  %v2713_v14 = vsub.f32 1.0, %v3792_v44  ;;  %v2769_v57 = vmul.f32 %v3896_v62, %v3792_v44  ;;  %v5309_v43 = vpop.f32.mrb[59].mxu1  ;;  %v3897_v31 = vld [vmem:[%s4388_s16 + $0x80] sm:$0xff] }
 0x230   : > { %5593 = vst [vmem:[#allocation36_spill] sm:$0xff] %v5309_v43  ;;  %v3796_v16 = vpop.eup %3795  ;;  %3813 = vrcp.f32 %v2157_v58  ;;  %v2158_v15 = vadd.f32 1.0, %v3794_v41  ;;  %v3225_v35 = vmul.f32 -1.442695, %v2275_v17  ;;  %vm2635_vm14 = vcmp.ge.f32.partialorder %v2607_v21, 0.0  ;;  %v3898_v17 = vld [vmem:[%s4388_s16 + $0x88] sm:$0xff] }
 0x231   : > { %v5312_v22 = vpop.eup %3797  ;;  %2824 = vst [vmem:[%s5120_s19 + $0x48] sm:$0xff] %v2796_v7  ;;  %v2741_v18 = vmul.f32 %v2713_v14, %v2685_v26  ;;  %3815 = vpow2.f32 %v3219_v28  ;;  %v2719_v19 = vsub.f32 1.0, %v3796_v16  ;;  %v2775_v54 = vmul.f32 %v3897_v31, %v3796_v16 }
 0x232   : > { %v3800_v44 = vpop.eup %3799  ;;  %3817 = vrcp.f32 %v2158_v15  ;;  %v2663_v62 = vmul.f32 0.2, %v2607_v21  ;;  %v2552_v58 = vadd.f32 %v4924_v29, %v5185_v55  ;;  %v2276_v16 = vadd.f32 %v4882_v3, %v5187_v60 }
 0x233   : > { %v3802_v41 = vpop.eup %3801  ;;  %v2797_v8 = vadd.f32 %v2769_v57, %v2741_v18  ;;  %3819 = vpow2.f32 %v3225_v35  ;;  %v2720_v23 = vsub.f32 1.0, %v3800_v44  ;;  %v2776_v43 = vmul.f32 %v3898_v17, %v3800_v44 }
 0x234   : > { %v5319_v7 = vpop.eup %3803  ;;  %v2164_v28 = vadd.f32 1.0, %v3802_v41  ;;  %v2691_v26 = vsel %vm2635_vm14, %v2607_v21, %v2663_v62  ;;  %v2580_v14 = vmul.f32 %v5209_v33, %v2552_v58  ;;  %v2558_v55 = vadd.f32 %v4927_v34, %v5203_v51  ;;  %v5594_v33 = vld [vmem:[#allocation28_spill] sm:$0xff]  ;;  %v3899_v58 = vld [vmem:[%s4388_s16 + $0xb8] sm:$0xff] }
 0x235   : > { %v3806_v15 = vpop.eup %3805  ;;  %2825 = vst [vmem:[%s5120_s19 + $0x50] sm:$0xff] %v2797_v8  ;;  %v2747_v31 = vmul.f32 %v2719_v19, %v2691_v26  ;;  %v2282_v57 = vadd.f32 %v4884_v4, %v5205_v52  ;;  %v2559_v35 = vadd.f32 %v4927_v34, %v5211_v53  ;;  %v3226_v44 = vmul.f32 -1.442695, %v2276_v16  ;;  %v3900_v16 = vld [vmem:[%s4388_s16 + $0xc0] sm:$0xff] }
 0x236   : > { %v5331_v18 = vpop.eup %3807  ;;  %3821 = vrcp.f32 %v2164_v28  ;;  %v2608_v21 = vadd.f32 %v2580_v14, %v5594_v33  ;;  %v2726_v60 = vsub.f32 1.0, %v3806_v15  ;;  %v2586_v19 = vmul.f32 %v5226_v24, %v2558_v55  ;;  %v5595_v28 = vld [vmem:[#allocation30_spill] sm:$0xff] }
 0x237   : > { %v2803_v62 = vadd.f32 %v2775_v54, %v2747_v31  ;;  %v2782_v51 = vmul.f32 %v3899_v58, %v3806_v15  ;;  %v3232_v41 = vmul.f32 -1.442695, %v2282_v57  ;;  %3823 = vpow2.f32 %v3226_v44  ;;  %v5596_v15 = vld [vmem:[#allocation32_spill] sm:$0xff] }
 0x238   : > { %v3810_v8 = vpop.eup %3809  ;;  %vm2636_vm15 = vcmp.ge.f32.partialorder %v2608_v21, 0.0  ;;  %v2664_v52 = vmul.f32 0.2, %v2608_v21  ;;  %v2587_v53 = vmul.f32 %v5234_v25, %v2559_v35  ;;  %v2614_v26 = vadd.f32 %v2586_v19, %v5595_v28 }
 0x239   : > { %v5337_v17 = vpop.eup %3811  ;;  %2831 = vst [vmem:[%s5120_s19 + $0x80] sm:$0xff] %v2803_v62  ;;  %3825 = vpow2.f32 %v3232_v41  ;;  %v2727_v14 = vsub.f32 1.0, %v3810_v8  ;;  %v2783_v54 = vmul.f32 %v3900_v16, %v3810_v8  ;;  %v2283_v57 = vadd.f32 %v4884_v4, %v5213_v48 }
 0x23a   : > { %v5342_v31 = vpop.eup %3813  ;;  %v2692_v24 = vsel %vm2636_vm15, %v2608_v21, %v2664_v52  ;;  %v2615_v55 = vadd.f32 %v2587_v53, %v5596_v15  ;;  %v2289_v25 = vadd.f32 %v4892_v10, %v5222_v32  ;;  %vm2642_vm0 = vcmp.ge.f32.partialorder %v2614_v26, 0.0 }
 0x23b   : > { %v3816_v35 = vpop.eup %3815  ;;  %v2748_v33 = vmul.f32 %v2720_v23, %v2692_v24  ;;  %v2670_v44 = vmul.f32 0.2, %v2614_v26  ;;  %v2040_v62 = vadd.f32 %v5224_v5, %v4878_v1  ;;  %v3233_v41 = vmul.f32 -1.442695, %v2283_v57 }
 0x23c   : > { %v5351_v19 = vpop.eup %3817  ;;  %v2165_v58 = vadd.f32 1.0, %v3816_v35  ;;  %vm2643_vm1 = vcmp.ge.f32.partialorder %v2615_v55, 0.0  ;;  %v2671_v21 = vmul.f32 0.2, %v2615_v55  ;;  %v3239_v53 = vmul.f32 -1.442695, %v2289_v25 }
 0x23d   : > { %v3820_v8 = vpop.eup %3819  ;;  %v2804_v52 = vadd.f32 %v2776_v43, %v2748_v33  ;;  %v2698_v48 = vsel %vm2642_vm0, %v2614_v26, %v2670_v44  ;;  %v3206_v28 = vmul.f32 -1.442695, %v2040_v62  ;;  %v2290_v1 = vadd.f32 %v4892_v10, %v5230_v30 }
 0x23e   : > { %3827 = vrcp.f32 %v2165_v58  ;;  %v2387_v32 = vadd.f32 1.0, %v3820_v8  ;;  %v2754_v23 = vmul.f32 %v2726_v60, %v2698_v48  ;;  %v2699_v16 = vsel %vm2643_vm1, %v2615_v55, %v2671_v21  ;;  %v5598_v21 = vld [vmem:[#allocation20_spill] sm:$0xff]  ;;  %v5599_v8 = vld [vmem:[#allocation22_spill] sm:$0xff] }
 0x23f   : > { %2832 = vst [vmem:[%s5120_s19 + $0x88] sm:$0xff] %v2804_v52  ;;  %v2755_v24 = vmul.f32 %v2727_v14, %v2699_v16  ;;  %3829 = vpow2.f32 %v3233_v41  ;;  %v2033_v5 = vadd.f32 %v4874_v63, %v5232_v27  ;;  %v2296_v26 = vadd.f32 %v4894_v11, %v5246_v38 }
 0x240   : > { %v5358_v15 = vpop.eup %3821  ;;  %3831 = vrcp.f32 %v2387_v32  ;;  %v2810_v43 = vadd.f32 %v2782_v51, %v2754_v23  ;;  %v2054_v60 = vadd.f32 %v5248_v49, %v4880_v2  ;;  %v3240_v14 = vmul.f32 -1.442695, %v2290_v1 }
 0x241   : > { %v2811_v55 = vadd.f32 %v2783_v54, %v2755_v24  ;;  %3833 = vpow2.f32 %v3239_v53  ;;  %v3199_v57 = vmul.f32 -1.442695, %v2033_v5  ;;  %v3824_v25 = vpop.eup %3823  ;;  %v3246_v30 = vmul.f32 -1.442695, %v2296_v26  ;;  %v5601_v53 = vld [vmem:[#allocation21_spill] sm:$0xff]  ;;  %v3901_v26 = vld [vmem:[%s4388_s16 + $0x20] sm:$0xff] }
 0x242   : > { %2838 = vst [vmem:[%s5120_s19 + $0xb8] sm:$0xff] %v2810_v43  ;;  %3835 = vpow2.f32 %v3206_v28  ;;  %v3220_v63 = vmul.f32 -1.442695, %v2054_v60  ;;  %v2297_v27 = vadd.f32 %v4894_v11, %v5252_v59  ;;  %v2388_v51 = vadd.f32 1.0, %v3824_v25 }
 0x243   : > { %v3826_v35 = vpop.eup %3825  ;;  %2839 = vst [vmem:[%s5120_s19 + $0xc0] sm:$0xff] %v2811_v55  ;;  %3837 = vpow2.f32 %v3240_v14  ;;  %v2047_v38 = vadd.f32 %v4876_v0, %v5254_v9  ;;  %v2539_v2 = vadd.f32 %v4912_v20, %v5263_v36  ;;  %v2284_v33 = vadd.f32 %v5265_v56, %v4884_v4  ;;  %v5597_v9 = vld [vmem:[#allocation16_spill] sm:$0xff] }
 0x244   : > { %v2394_v49 = vadd.f32 1.0, %v3826_v35  ;;  %3839 = vpow2.f32 %v3199_v57  ;;  %v3247_v54 = vmul.f32 -1.442695, %v2297_v27  ;;  %v2540_v62 = vadd.f32 %v4912_v20, %v5268_v46  ;;  %v5600_v46 = vld [vmem:[#allocation17_spill] sm:$0xff] }
 0x245   : > { %3841 = vrcp.f32 %v2388_v51  ;;  %v3213_v44 = vmul.f32 -1.442695, %v2047_v38  ;;  %v2567_v59 = vmul.f32 %v5312_v22, %v2539_v2  ;;  %v3234_v58 = vmul.f32 -1.442695, %v2284_v33  ;;  %v3902_v33 = vld [vmem:[%s4388_s16 + $0x28] sm:$0xff] }
 0x246   : > { %3843 = vrcp.f32 %v2394_v49  ;;  %v2277_v0 = vadd.f32 %v4882_v3, %v5270_v6  ;;  %v2546_v36 = vadd.f32 %v5597_v9, %v5272_v47  ;;  %v2568_v4 = vmul.f32 %v5319_v7, %v2540_v62 }
 0x247   : > { %3845 = vpow2.f32 %v3246_v30  ;;  %v2595_v41 = vadd.f32 %v2567_v59, %v5598_v21  ;;  %v2298_v56 = vadd.f32 %v5274_v39, %v4894_v11  ;;  %v5389_v52 = vadd.f32 %v5600_v46, %v5599_v8  ;;  %v5602_v11 = vld [vmem:[#allocation23_spill] sm:$0xff] }
 0x248   : > { %v5385_v22 = vpop.eup %3827  ;;  %3847 = vpow2.f32 %v3220_v63  ;;  %v3227_v48 = vmul.f32 -1.442695, %v2277_v0  ;;  %v2574_v3 = vmul.f32 %v5331_v18, %v2546_v36  ;;  %v2596_v7 = vadd.f32 %v2568_v4, %v5601_v53  ;;  %v5603_v0 = vld [vmem:[#allocation24_spill] sm:$0xff] }
 0x249   : > { %v3830_v6 = vpop.eup %3829  ;;  %3849 = vpow2.f32 %v3247_v54  ;;  %vm2623_vm2 = vcmp.ge.f32.partialorder %v2595_v41, 0.0  ;;  %v2651_v47 = vmul.f32 0.2, %v2595_v41  ;;  %v2547_v23 = vadd.f32 %v5597_v9, %v5277_v40 }
 0x24a   : > { %v3832_v28 = vpop.eup %3831  ;;  %v2395_v32 = vadd.f32 1.0, %v3830_v6  ;;  %3851 = vpow2.f32 %v3213_v44  ;;  %v2602_v39 = vadd.f32 %v2574_v3, %v5602_v11  ;;  %v3248_v18 = vmul.f32 -1.442695, %v2298_v56 }
 0x24b   : > { %v3834_v16 = vpop.eup %3833  ;;  %v2679_v24 = vsel %vm2623_vm2, %v2595_v41, %v2651_v47  ;;  %v2707_v1 = vsub.f32 1.0, %v3832_v28  ;;  %3853 = vpow2.f32 %v3234_v58  ;;  %v2763_v60 = vmul.f32 %v3901_v26, %v3832_v28 }
 0x24c   : > { %v3836_v5 = vpop.eup %3835  ;;  %3855 = vrcp.f32 %v2395_v32  ;;  %v2401_v43 = vadd.f32 1.0, %v3834_v16  ;;  %v2652_v55 = vmul.f32 0.2, %v2596_v7  ;;  %vm2624_vm3 = vcmp.ge.f32.partialorder %v2596_v7, 0.0 }
 0x24d   : > { %v3838_v14 = vpop.eup %3837  ;;  %v2152_v57 = vadd.f32 1.0, %v3836_v5  ;;  %v2735_v25 = vmul.f32 %v2707_v1, %v2679_v24  ;;  %3857 = vpow2.f32 %v3227_v48  ;;  %vm2630_vm4 = vcmp.ge.f32.partialorder %v2602_v39, 0.0  ;;  %v3903_v48 = vld [vmem:[%s4388_s16 + $0x58] sm:$0xff] }
 0x24e   : > { %v3840_v30 = vpop.eup %3839  ;;  %3859 = vrcp.f32 %v2401_v43  ;;  %v2402_v40 = vadd.f32 1.0, %v3838_v14  ;;  %v2658_v63 = vmul.f32 0.2, %v2602_v39  ;;  %v2575_v38 = vmul.f32 %v5337_v17, %v2547_v23 }
 0x24f   : > { %v3842_v27 = vpop.eup %3841  ;;  %3861 = vrcp.f32 %v2152_v57  ;;  %v2145_v35 = vadd.f32 1.0, %v3840_v30  ;;  %v2791_v51 = vadd.f32 %v2763_v60, %v2735_v25  ;;  %v2680_v49 = vsel %vm2624_vm3, %v2596_v7, %v2652_v55 }
 0x250   : > { %v3844_v2 = vpop.eup %3843  ;;  %3863 = vrcp.f32 %v2402_v40  ;;  %v2708_v54 = vsub.f32 1.0, %v3842_v27  ;;  %v2764_v44 = vmul.f32 %v3902_v33, %v3842_v27  ;;  %v2686_v62 = vsel %vm2630_vm4, %v2602_v39, %v2658_v63  ;;  %v5606_v63 = vld [vmem:[#allocation35_spill] sm:$0xff] }
 0x251   : > { %v3846_v59 = vpop.eup %3845  ;;  %3865 = vrcp.f32 %v2145_v35  ;;  %2819 = vst [vmem:[%s5120_s19 + $0x20] sm:$0xff] %v2791_v51  ;;  %v2714_v58 = vsub.f32 1.0, %v3844_v2  ;;  %v2603_v36 = vadd.f32 %v2575_v38, %v5603_v0  ;;  %v2291_v17 = vadd.f32 %v4892_v10, %v5279_v12  ;;  %v5604_v10 = vld [vmem:[#allocation19_spill] sm:$0xff]  ;;  %v5605_v12 = vld [vmem:[#allocation25_spill] sm:$0xff] }
 0x252   : > { %v3848_v21 = vpop.eup %3847  ;;  %v2408_v41 = vadd.f32 1.0, %v3846_v59  ;;  %v2736_v4 = vmul.f32 %v2708_v54, %v2680_v49  ;;  %3867 = vpow2.f32 %v3248_v18  ;;  %v2770_v3 = vmul.f32 %v3903_v48, %v3844_v2 }
 0x253   : > { %v3850_v56 = vpop.eup %3849  ;;  %v2166_v8 = vadd.f32 1.0, %v3848_v21  ;;  %v2742_v46 = vmul.f32 %v2714_v58, %v2686_v62  ;;  %v2659_v6 = vmul.f32 0.2, %v2603_v36  ;;  %vm2631_vm5 = vcmp.ge.f32.partialorder %v2603_v36, 0.0  ;;  %v5609_v58 = vld [vmem:[#allocation29_spill] sm:$0xff] }
 0x254   : > { %v3852_v47 = vpop.eup %3851  ;;  %3869 = vrcp.f32 %v2408_v41  ;;  %v2409_v53 = vadd.f32 1.0, %v3850_v56  ;;  %v2792_v7 = vadd.f32 %v2764_v44, %v2736_v4  ;;  %v3241_v39 = vmul.f32 -1.442695, %v2291_v17 }
 0x255   : > { %v3854_v28 = vpop.eup %3853  ;;  %3871 = vrcp.f32 %v2166_v8  ;;  %v2159_v32 = vadd.f32 1.0, %v3852_v47  ;;  %v2798_v11 = vadd.f32 %v2770_v3, %v2742_v46  ;;  %v5407_v16 = vadd.f32 %v5605_v12, %v5604_v10  ;;  %v3906_v47 = vld [vmem:[%s4388_s16 + $0x98] sm:$0xff] }
 0x256   : > { %v3856_v23 = vpop.eup %3855  ;;  %3873 = vrcp.f32 %v2409_v53  ;;  %v2396_v24 = vadd.f32 1.0, %v3854_v28  ;;  %2820 = vst [vmem:[%s5120_s19 + $0x28] sm:$0xff] %v2792_v7  ;;  %v2553_v1 = vadd.f32 %v4924_v29, %v5289_v50  ;;  %v2687_v5 = vsel %vm2631_vm5, %v2603_v36, %v2659_v6  ;;  %v3904_v50 = vld [vmem:[%s4388_s16 + $0x60] sm:$0xff]  ;;  %v5610_v7 = vld [vmem:[#allocation31_spill] sm:$0xff] }
 0x257   : > { %v3858_v18 = vpop.eup %3857  ;;  %3875 = vrcp.f32 %v2159_v32  ;;  %2826 = vst [vmem:[%s5120_s19 + $0x58] sm:$0xff] %v2798_v11  ;;  %v2715_v43 = vsub.f32 1.0, %v3856_v23  ;;  %v2554_v26 = vadd.f32 %v4924_v29, %v5294_v37  ;;  %v2548_v57 = vadd.f32 %v5291_v45, %v5597_v9  ;;  %v5607_v37 = vld [vmem:[#allocation26_spill] sm:$0xff] }
 0x258   : > { %v3860_v60 = vpop.eup %3859  ;;  %3877 = vrcp.f32 %v2396_v24  ;;  %v2389_v55 = vadd.f32 1.0, %v3858_v18  ;;  %v2581_v14 = vmul.f32 %v5342_v31, %v2553_v1  ;;  %v2771_v40 = vmul.f32 %v3904_v50, %v3856_v23  ;;  %v3905_v45 = vld [vmem:[%s4388_s16 + $0x90] sm:$0xff]  ;;  %v3908_v50 = vld [vmem:[%s4388_s16 + $0x68] sm:$0xff] }
 0x259   : > { %v3862_v25 = vpop.eup %3861  ;;  %v2743_v30 = vmul.f32 %v2715_v43, %v2687_v5  ;;  %3879 = vpow2.f32 %v3241_v39  ;;  %v2541_v27 = vadd.f32 %v4912_v20, %v5606_v63  ;;  %v2582_v31 = vmul.f32 %v5351_v19, %v2554_v26  ;;  %v5608_v20 = vld [vmem:[#allocation34_spill] sm:$0xff]  ;;  %v3907_v43 = vld [vmem:[%s4388_s16 + $0xc8] sm:$0xff] }
 0x25a   : > { %v3864_v35 = vpop.eup %3863  ;;  %3881 = vrcp.f32 %v2389_v55  ;;  %v2609_v51 = vadd.f32 %v2581_v14, %v5607_v37  ;;  %v2576_v38 = vmul.f32 %v3862_v25, %v2548_v57  ;;  %v2721_v54 = vsub.f32 1.0, %v3860_v60  ;;  %v3909_v37 = vld [vmem:[%s4388_s16 + $0x30] sm:$0xff] }
 0x25b   : > { %v3866_v2 = vpop.eup %3865  ;;  %v2799_v49 = vadd.f32 %v2771_v40, %v2743_v30  ;;  %v2777_v9 = vmul.f32 %v3905_v45, %v3860_v60  ;;  %v2560_v33 = vadd.f32 %v4927_v34, %v5302_v13  ;;  %v2610_v0 = vadd.f32 %v2582_v31, %v5609_v58 }
 0x25c   : > { %v3868_v44 = vpop.eup %3867  ;;  %vm2637_vm6 = vcmp.ge.f32.partialorder %v2609_v51, 0.0  ;;  %v2665_v59 = vmul.f32 0.2, %v2609_v51  ;;  %v2604_v62 = vadd.f32 %v2576_v38, %v5608_v20  ;;  %v2722_v21 = vsub.f32 1.0, %v3864_v35  ;;  %v5613_v20 = vld [vmem:[#allocation27_spill] sm:$0xff] }
 0x25d   : > { %v2410_v36 = vadd.f32 1.0, %v3868_v44  ;;  %2827 = vst [vmem:[%s5120_s19 + $0x60] sm:$0xff] %v2799_v49  ;;  %v2569_v19 = vmul.f32 %v3866_v2, %v2541_v27  ;;  %v2588_v41 = vmul.f32 %v5358_v15, %v2560_v33  ;;  %vm2638_vm8 = vcmp.ge.f32.partialorder %v2610_v0, 0.0  ;;  %v5611_v2 = vld [vmem:[#allocation33_spill] sm:$0xff]  ;;  %v5612_v33 = vld [vmem:[#allocation36_spill] sm:$0xff] }
 0x25e   : > { %v3870_v4 = vpop.eup %3869  ;;  %v2693_v17 = vsel %vm2637_vm6, %v2609_v51, %v2665_v59  ;;  %vm2632_vm7 = vcmp.ge.f32.partialorder %v2604_v62, 0.0  ;;  %v2660_v56 = vmul.f32 0.2, %v2604_v62  ;;  %v2666_v46 = vmul.f32 0.2, %v2610_v0 }
 0x25f   : > { %v3872_v13 = vpop.eup %3871  ;;  %3883 = vrcp.f32 %v2410_v36  ;;  %v2749_v8 = vmul.f32 %v2721_v54, %v2693_v17  ;;  %v2597_v48 = vadd.f32 %v2569_v19, %v5389_v52  ;;  %v2778_v53 = vmul.f32 %v3906_v47, %v3864_v35  ;;  %v3910_v19 = vld [vmem:[%s4388_s16 + $0xd8] sm:$0xff] }
 0x260   : > { %v5431_v3 = vpop.eup %3873  ;;  %v2688_v6 = vsel %vm2632_vm7, %v2604_v62, %v2660_v56  ;;  %v2616_v28 = vadd.f32 %v2588_v41, %v5610_v7  ;;  %v2562_v15 = vadd.f32 %v5304_v61, %v4927_v34  ;;  %v2694_v39 = vsel %vm2638_vm8, %v2610_v0, %v2666_v46  ;;  %v5614_v62 = vld [vmem:[#allocation18_spill] sm:$0xff] }
 0x261   : > { %v3876_v32 = vpop.eup %3875  ;;  %v2805_v11 = vadd.f32 %v2777_v9, %v2749_v8  ;;  %v2653_v23 = vmul.f32 0.2, %v2597_v48  ;;  %v2728_v10 = vsub.f32 1.0, %v3870_v4  ;;  %v2750_v24 = vmul.f32 %v2722_v21, %v2694_v39  ;;  %v3911_v56 = vld [vmem:[%s4388_s16 + $0xd0] sm:$0xff] }
 0x262   : > { %v3878_v12 = vpop.eup %3877  ;;  %vm2644_vm9 = vcmp.ge.f32.partialorder %v2616_v28, 0.0  ;;  %v2672_v52 = vmul.f32 0.2, %v2616_v28  ;;  %v2590_v1 = vmul.f32 %v3872_v13, %v2562_v15  ;;  %vm2625_vm10 = vcmp.ge.f32.partialorder %v2597_v48, 0.0 }
 0x263   : > { %v3880_v18 = vpop.eup %3879  ;;  %2833 = vst [vmem:[%s5120_s19 + $0x90] sm:$0xff] %v2805_v11  ;;  %v2716_v5 = vsub.f32 1.0, %v3878_v12  ;;  %v2784_v26 = vmul.f32 %v3907_v43, %v3870_v4  ;;  %v2561_v61 = vadd.f32 %v4927_v34, %v5307_v42  ;;  %v2806_v14 = vadd.f32 %v2778_v53, %v2750_v24 }
 0x264   : > { %v3882_v60 = vpop.eup %3881  ;;  %v2403_v55 = vadd.f32 1.0, %v3880_v18  ;;  %v2700_v57 = vsel %vm2644_vm9, %v2616_v28, %v2672_v52  ;;  %v2618_v25 = vadd.f32 %v2590_v1, %v5407_v16  ;;  %v2772_v40 = vmul.f32 %v3908_v50, %v3878_v12  ;;  %v3912_v28 = vld [vmem:[%s4388_s16 + $0xa0] sm:$0xff] }
 0x265   : > { %v2744_v30 = vmul.f32 %v2716_v5, %v2688_v6  ;;  %v2709_v63 = vsub.f32 1.0, %v3882_v60  ;;  %v2756_v27 = vmul.f32 %v2728_v10, %v2700_v57  ;;  %2834 = vst [vmem:[%s5120_s19 + $0x98] sm:$0xff] %v2806_v14  ;;  %v2681_v35 = vsel %vm2625_vm10, %v2597_v48, %v2653_v23 }
 0x266   : > { %3885 = vrcp.f32 %v2403_v55  ;;  %v2765_v51 = vmul.f32 %v3909_v37, %v3882_v60  ;;  %v2589_v34 = vmul.f32 %v5385_v22, %v2561_v61  ;;  %v2674_v16 = vmul.f32 0.2, %v2618_v25 }
 0x267   : > { %v2800_v42 = vadd.f32 %v2772_v40, %v2744_v30  ;;  %v2737_v38 = vmul.f32 %v2709_v63, %v2681_v35  ;;  %v2812_v31 = vadd.f32 %v2784_v26, %v2756_v27  ;;  %vm2646_vm11 = vcmp.ge.f32.partialorder %v2618_v25, 0.0 }
 0x268   : > { %v2617_v49 = vadd.f32 %v2589_v34, %v5611_v2  ;;  %v2729_v9 = vsub.f32 1.0, %v5431_v3  ;;  %v2555_v44 = vadd.f32 %v4924_v29, %v5612_v33  ;;  %v2507_v58 = vadd.f32 %v5614_v62, %v5613_v20 }
 0x269   : > { %v3884_v54 = vpop.eup %3883  ;;  %2828 = vst [vmem:[%s5120_s19 + $0x68] sm:$0xff] %v2800_v42  ;;  %v2793_v45 = vadd.f32 %v2765_v51, %v2737_v38  ;;  %2840 = vst [vmem:[%s5120_s19 + $0xc8] sm:$0xff] %v2812_v31  ;;  %v2702_v0 = vsel %vm2646_vm11, %v2618_v25, %v2674_v16  ;;  %v2785_v29 = vmul.f32 %v3911_v56, %v5431_v3 }
 0x26a   : > { %v2730_v22 = vsub.f32 1.0, %v3884_v54  ;;  %vm2645_vm12 = vcmp.ge.f32.partialorder %v2617_v49, 0.0  ;;  %v2673_v59 = vmul.f32 0.2, %v2617_v49  ;;  %v2583_v36 = vmul.f32 %v3876_v32, %v2555_v44 }
 0x26b   : > { %2821 = vst [vmem:[%s5120_s19 + $0x30] sm:$0xff] %v2793_v45  ;;  %v2786_v41 = vmul.f32 %v3910_v19, %v3884_v54 }
 0x26c   : > { %v2758_v21 = vmul.f32 %v2730_v22, %v2702_v0  ;;  %v2701_v4 = vsel %vm2645_vm12, %v2617_v49, %v2673_v59  ;;  %v2611_v13 = vadd.f32 %v2583_v36, %v2507_v58 }
 0x26d   : > { %v2757_v17 = vmul.f32 %v2729_v9, %v2701_v4 }
 0x26e   : > { %v2814_v8 = vadd.f32 %v2786_v41, %v2758_v21  ;;  %vm2639_vm13 = vcmp.ge.f32.partialorder %v2611_v13, 0.0  ;;  %v2667_v48 = vmul.f32 0.2, %v2611_v13 }
 0x26f   : > { %v2813_v46 = vadd.f32 %v2785_v29, %v2757_v17 }
 0x270   : > { %v3886_v6 = vpop.eup %3885  ;;  %2842 = vst [vmem:[%s5120_s19 + $0xd8] sm:$0xff] %v2814_v8  ;;  %v2695_v53 = vsel %vm2639_vm13, %v2611_v13, %v2667_v48 }
 0x271   : > { %2841 = vst [vmem:[%s5120_s19 + $0xd0] sm:$0xff] %v2813_v46  ;;  %v2723_v47 = vsub.f32 1.0, %v3886_v6  ;;  %v2779_v15 = vmul.f32 %v3912_v28, %v3886_v6  ;;  %2850 = sbr.rel (!%p4246_p9) target bundleno = 663 (0x297), region = 118 }
 0x273   : > { %v2751_v7 = vmul.f32 %v2723_v47, %v2695_v53 }
 0x275   : > { %v2807_v32 = vadd.f32 %v2779_v15, %v2751_v7 }
 0x277   : > { %2835 = vst [vmem:[%s5120_s19 + $0xa0] sm:$0xff] %v2807_v32 }
 0x278   : > { %s5646_s15 = smov (!%p2853_p8, %s2852_s15), 7 }
 0x279   : > { %s5470_s17 = sshll.u32 %s5646_s15, 9 }
 0x27a   : > { %s2857_s11 = ssub.s32 3584, %s5470_s17 }
 0x27b   : > { %2858 = vsyncadd %s2844_s6, %s2857_s11  ;;  %s5616_s16 = sld [smem:[#allocation11_spill]]  ;;  %p3250_p9 = scmp.ne.s32.totalorder %s5470_s17, 0 }
 0x27c   : > { %s3253_s29 = sshll.u32 %s5646_s15, 3  ;;  %s2866_s24 = sshll.u32 %s5120_s19, 4  ;;  %s5484_s24 = int_to_ptr.vmem [resolvable:$true] %s2866_s24 }
 0x27d   : > { %s5617_s14 = sld [smem:[#allocation38_spill]]  ;;  %s3941_s20 = scalar_lea.vmem %s5484_s24, %s5470_s17 }
 0x27e   : > { %p3942_p3 = scmp.ne.s32.totalorder %s5484_s24, %s3941_s20  ;;  %s4144_s10 = smov [#allocation6]  }
 0x27f   : > { %s3945_s9 = sshll.u32 %s4144_s10, 4  ;;  %s3946_s9 = int_to_ptr.vmem [resolvable:$false] %s3945_s9 }
 0x280   : > { %p3943_p0 = pnand %p3942_p3, %p3250_p9  ;;  %s3947_s0 = scalar_lea.vmem %s3946_s9, 7168 }
 0x281   : > { %s3251_s12 = sshll.u32 %s5616_s16, 5  ;;  %p3948_p2 = scmp.lt.s32.totalorder %s5484_s24, %s3946_s9 }
 0x282   : > { %s2861_s13 = sadd.s32 %s3251_s12, %s2851_s25  ;;  %p3944_p1 = pneg %p3943_p0 }
 0x283   : > { %s3252_s21 = sshll.u32 %s2861_s13, 7  ;;  %p3949_p4 = scmp.lt.s32.totalorder %s3947_s0, %s3941_s20 }
 0x284   : > { %s5482_s8 = scalar_lea.hbm %s5617_s14, %s3252_s21 }
 0x285   : > { %p3950_p5 = por %p3949_p4, %p3948_p2 }
 0x287   : > { %p3951_p7 = pnand %p3950_p5, %p3944_p1 }
 0x289   : > { %3954 = shalt.err (!%p3951_p7)
}
 0x28a   : > { %s3955_s19 = scalar_lea.hbm %s5482_s8, %s5470_s17  ;;  %s3959_s16 = scalar_lea.hbm %s5617_s14, 8192 }
 0x28b   : > { %p3956_p10 = scmp.ne.s32.totalorder %s5482_s8, %s3955_s19  ;;  %p3960_p13 = scmp.lt.u32.totalorder %s5482_s8, %s5617_s14 }
 0x28c   : > { %p3961_p12 = scmp.lt.u32.totalorder %s3959_s16, %s3955_s19  ;;  %p3963_p3 = scmp.lt.u32.totalorder %s3955_s19, %s5482_s8 }
 0x28d   : > { %p3957_p11 = pnand %p3956_p10, %p3250_p9 }
 0x28e   : > { %p3962_p8 = por %p3961_p12, %p3960_p13 }
 0x28f   : > { %p3958_p6 = pneg %p3957_p11 }
 0x290   : > { %p3964_p0 = por %p3963_p3, %p3962_p8 }
 0x292   : > { %p3965_p1 = pnand %p3964_p0, %p3958_p6 }
 0x294   : > { %3968 = shalt.err (!%p3965_p1)
}
 0x295   : > { %s4145_s21 = smov 896   ;;  %s4146_s18 = smov 1024  }
 0x296   : > { %2872 = dma.vmem_to_hbm [thread:$0]  (%p3250_p9), %s5484_s24, %s5470_s17, %s5482_s8, %s2844_s6, %s4145_s21, %s4146_s18, %s3253_s29  }
 0x297 PF: > { %s5618_s30 = sld [smem:[#allocation9_spill]]  ;;  %s5619_s20 = sld [smem:[#allocation14_spill]] }
 0x298   : > { %p3460_p2 = scmp.ge.s32.totalorder %s4103_s28, 2 }
 0x29d   : > { %s2881_s10 = sand.u32 1, %s5618_s30   ;;  %p5620_p4 = scmp.ne.s32.totalorder %s5619_s20, 0 }
 0x29e   : > { %s2882_s9 = scalar_lea.sflag [#allocation5], %s2881_s10 }
 0x29f   : > { %p3457_p5 = pnand %p3460_p2, %p5620_p4 }
 0x2a1   : > { %4070 = dma.done.wait (!%p3457_p5), %s2882_s9, 3584  }
 0x2a2   : > { %4072 = vsyncadd (!%p3457_p5), %s2882_s9, 4294963712  ;;  %s22_s28 = sadd.s32 1, %s4103_s28   ;;  %s5621_s15 = sld [smem:[#allocation15_spill]] }
 0x2a3   : > { %p19_p7 = scmp.ge.s32.totalorder %s22_s28, 6   ;;  %s5622_s7 = sld [smem:[#allocation12_spill]] }
 0x2a4   : > { %s5623_s6 = sld [smem:[#allocation13_spill]]  ;;  %s5624_s21 = smov %s4079_s22 }
 0x2a5   : > { %s5625_s22 = smov %s4083_s23  ;;  %s5627_s24 = smov %s4095_s26 }
 0x2a6   : > { %s5628_s25 = smov %s4099_s27  ;;  %21 = sbr.rel (!%p19_p7) target bundleno = 10 (0xa), region = 225 }
 0x2a8   : > { %s5626_s23 = smov %s5621_s15 }
 0x2a9   : > { %s5629_s26 = smov %s5622_s7 }
 0x2aa   : > { %s5630_s27 = smov %s5623_s6 }
 0x2ad   :  { %2887 = vsyncpa [#allocation4], 1 }
 0x2ae   :  { %2889 = vsyncpa [#allocation4 + $0x1], 1 }
 0x2af   :  { %2890 = vsyncpa [#allocation5], 1 }
 0x2b0   :  { %2892 = vsyncpa [#allocation5 + $0x1], 1 }

</bundles_post_ra>
